<compile_context>
chip_gen: v6e
topology: v6e:2x2x1
jax: 0.10.0
libtpu: 0.0.40
codegen_flags: <defaults>
</compile_context>

<pallas_src>
import jax
import jax.numpy as jnp
from jax.experimental import pallas as pl
from jax.experimental.pallas import tpu as pltpu

_GELU_K = 0.7978845608028654  # sqrt(2/pi)


def _gelu(x):
    # tanh-GELU (EUP tanh); not bit-exact vs torch's exact-erf GELU (~1e-3 abs).
    return 0.5 * x * (1.0 + jnp.tanh(_GELU_K * (x + 0.044715 * x * x * x)))


def _spectral_fused_kernel(x_ref, w1_ref, w2_ref, wo_ref,
                           s12_ref, b12_ref, so_ref, bo_ref,
                           o_ref, z_ref):
    """One grid step = one batch element; all three stages fused.

    x_ref : (1, max_k, n2, C*max_k) bf16   stage-1 im2col, rows grouped (tap t, window w)
    w1_ref: (C*max_k, 3E)           bf16   fused stage-1 weights (flat window)
    w2_ref: (max_k, 3E, 3E)         bf16   fused stage-2 weights (per tap)
    wo_ref: (3, 3E, E)              bf16   out-block weights (per tap)
    s12/b12: (1, 3E) f32  folded conv-bias+BN for stage 1 AND 2 (same modules)
    so/bo  : (1, E)  f32  folded conv-bias+BN for the out block
    o_ref  : (1, n2, E) f32 output block
    z_ref  : (n2+2, 3E) f32 VMEM scratch = zero-padded stage-2 output ('same' conv)
    """
    max_k = x_ref.shape[1]
    n2 = x_ref.shape[2]
    c2 = w1_ref.shape[1]          # 3 * embedding_dim

    w1 = w1_ref[...]
    s12 = s12_ref[...]
    b12 = b12_ref[...]

    # ---- stage 1 + stage 2 fused (stage-1 activations never leave vregs) ----
    acc2 = jnp.zeros((n2, c2), jnp.float32)
    for t in range(max_k):        # static unroll; max_k is small (e.g. 7)
        x_t = x_ref[0, t, :, :]                                    # (n2, C*max_k)
        h1 = jnp.dot(x_t, w1, preferred_element_type=jnp.float32)  # (n2, 3E)
        y1 = _gelu(h1 * s12 + b12)                                 # stage-1 act
        acc2 = acc2 + jnp.dot(y1.astype(jnp.bfloat16), w2_ref[t, :, :],
                              preferred_element_type=jnp.float32)
    y2 = _gelu(acc2 * s12 + b12)                                   # (n2, 3E)

    # ---- out block: Conv1d(3E->E, k=3, stride=1, 'same') + BN + GELU --------
    z_ref[...] = jnp.zeros(z_ref.shape, z_ref.dtype)               # zero pad rows
    z_ref[pl.ds(1, n2), :] = y2
    acc3 = jnp.zeros((n2, wo_ref.shape[2]), jnp.float32)
    for j in range(wo_ref.shape[0]):                               # 3 taps
        acc3 = acc3 + jnp.dot(z_ref[pl.ds(j, n2), :].astype(jnp.bfloat16),
                              wo_ref[j, :, :],
                              preferred_element_type=jnp.float32)
    o_ref[0, :, :] = _gelu(acc3 * so_ref[...] + bo_ref[...]).astype(o_ref.dtype)


# ----------------------------- parameter plumbing ----------------------------

def _init_block(key, e, c, k):
    k1, k2, k3, k4, k5, k6 = jax.random.split(key, 6)
    fan_in = c * k
    return dict(
        w=jax.random.normal(k1, (e, c, k), jnp.float32) / jnp.sqrt(fan_in),
        b=0.1 * jax.random.normal(k2, (e,), jnp.float32),
        bn_gamma=1.0 + 0.1 * jax.random.normal(k3, (e,), jnp.float32),
        bn_beta=0.1 * jax.random.normal(k4, (e,), jnp.float32),
        bn_mean=0.1 * jax.random.normal(k5, (e,), jnp.float32),
        bn_var=jax.nn.softplus(jax.random.normal(k6, (e,), jnp.float32)) + 0.5,
        bn_eps=1e-5,
    )


def _fold_bn(p):
    """Eval-mode BatchNorm + conv bias folded into per-channel (scale, bias)."""
    inv_std = 1.0 / jnp.sqrt(p["bn_var"] + p["bn_eps"])
    scale = p["bn_gamma"] * inv_std
    bias = p["bn_beta"] + scale * (p["b"] - p["bn_mean"])
    return scale, bias


def _fused_window_weight(blocks, kernel_sizes, max_k, offsets):
    """(C*max_k, n_blocks*E): row c*max_k + u applies to input channel c at
    window position u; block i's taps live at u in [offset_i, offset_i + k_i)."""
    mats = []
    for p, k, o in zip(blocks, kernel_sizes, offsets):
        w = p["w"]                                          # (E, C, k) torch layout
        e, c, _ = w.shape
        wpad = jnp.zeros((e, c, max_k), w.dtype).at[:, :, o:o + k].set(w)
        mats.append(jnp.transpose(wpad, (1, 2, 0)).reshape(c * max_k, e))
    return jnp.concatenate(mats, axis=1)


def _fused_tap_weights(blocks, kernel_sizes, offsets, n_taps):
    """(n_taps, C_in, n_blocks*E): W[t, c, i*E+e] = w_i[e, c, t - o_i] inside the
    block's tap window, zero outside."""
    mats = []
    for p, k, o in zip(blocks, kernel_sizes, offsets):
        w = p["w"]                                          # (E, C_in, k)
        e, c_in, _ = w.shape
        wt = jnp.zeros((n_taps, c_in, e), w.dtype).at[o:o + k].set(
            jnp.transpose(w, (2, 1, 0)))
        mats.append(wt)
    return jnp.concatenate(mats, axis=2)


class SpectralEmbeddingPallas:
    def __init__(self, in_channels, embedding_dim, kernel_sizes, key):
        # The reference re-applies the embedding blocks to their own concatenated
        # output, which only type-checks when in_channels == 3 * embedding_dim.
        assert len(kernel_sizes) == 3 and in_channels == 3 * embedding_dim
        self.kernel_sizes = [int(k) for k in kernel_sizes]
        self.max_k = max(self.kernel_sizes)
        self.embedding_dim = int(embedding_dim)
        self.in_channels = int(in_channels)

        keys = jax.random.split(key, len(kernel_sizes) + 1)
        self.block_params = [_init_block(keys[i], embedding_dim, in_channels, k)
                             for i, k in enumerate(self.kernel_sizes)]
        self.out_params = _init_block(keys[-1], embedding_dim, 3 * embedding_dim, 3)

        # ---- fold BN (eval) and fuse the three blocks' weights once ----------
        max_k = self.max_k
        scales, biases = zip(*[_fold_bn(p) for p in self.block_params])
        self.s12 = jnp.concatenate(scales)[None, :]                  # (1, 3E)
        self.b12 = jnp.concatenate(biases)[None, :]                  # (1, 3E)

        # stage 1: windows start at tap 0 inside each max_k chunk
        self.w1 = _fused_window_weight(
            self.block_params, self.kernel_sizes, max_k,
            [0] * len(self.kernel_sizes)).astype(jnp.bfloat16)       # (C*max_k, 3E)

        # stage 2: blocks centered inside the max_k window (reference slicing)
        self.offs2 = [int((max_k - k) / 2) for k in self.kernel_sizes]
        self.w2 = _fused_tap_weights(
            self.block_params, self.kernel_sizes, self.offs2,
            max_k).astype(jnp.bfloat16)                              # (max_k, 3E, 3E)

        # out block (k=3, stride 1, 'same')
        so, bo = _fold_bn(self.out_params)
        self.so, self.bo = so[None, :], bo[None, :]                  # (1, E)
        self.wo = _fused_tap_weights(
            [self.out_params], [3], [0], 3).astype(jnp.bfloat16)     # (3, 3E, E)

        self._forward = jax.jit(self._forward_impl)

    def _forward_impl(self, x):
        n_batch, c, length = x.shape
        assert c == self.in_channels
        max_k, e = self.max_k, self.embedding_dim
        c2 = 3 * e

        l_pad = pl.cdiv(length, max_k) * max_k
        n1 = l_pad // max_k                                # stage-1 output length
        # stage-2 output length (must match across blocks, as torch.cat requires)
        lens2 = [(n1 - o - k) // max_k + 1
                 for o, k in zip(self.offs2, self.kernel_sizes)]
        assert all(l == lens2[0] for l in lens2) and lens2[0] >= 1
        n2 = lens2[0]

        # stride == max_k => im2col is a pure reshape/transpose (no gather).
        # Only the first n2*max_k stage-1 positions can influence the output.
        x = jnp.pad(x, ((0, 0), (0, 0), (0, l_pad - length)))
        x = x[:, :, : n2 * max_k * max_k]
        x = x.reshape(n_batch, c, n2, max_k, max_k)        # (b, c, w, t, u)
        x = jnp.transpose(x, (0, 3, 2, 1, 4))              # (b, t, w, c, u)
        x1 = x.reshape(n_batch, max_k, n2, c * max_k).astype(jnp.bfloat16)

        out = pl.pallas_call(
            _spectral_fused_kernel,
            out_shape=jax.ShapeDtypeStruct((n_batch, n2, e), jnp.float32),
            grid=(n_batch,),
            in_specs=[
                pl.BlockSpec((1, max_k, n2, c * max_k), lambda b: (b, 0, 0, 0)),
                pl.BlockSpec((c * max_k, c2), lambda b: (0, 0)),
                pl.BlockSpec((max_k, c2, c2), lambda b: (0, 0, 0)),
                pl.BlockSpec((3, c2, e), lambda b: (0, 0, 0)),
                pl.BlockSpec((1, c2), lambda b: (0, 0)),
                pl.BlockSpec((1, c2), lambda b: (0, 0)),
                pl.BlockSpec((1, e), lambda b: (0, 0)),
                pl.BlockSpec((1, e), lambda b: (0, 0)),
            ],
            out_specs=pl.BlockSpec((1, n2, e), lambda b: (b, 0, 0)),
            scratch_shapes=[pltpu.VMEM((n2 + 2, c2), jnp.float32)],
            compiler_params=pltpu.CompilerParams(
                dimension_semantics=("parallel",)),
        )(x1, self.w1, self.w2, self.wo, self.s12, self.b12, self.so, self.bo)

        return jnp.transpose(out, (0, 2, 1))               # NCW: (batch, E, n2)

    def __call__(self, x):
        return self._forward(x), x.shape[-1]


if __name__ == "__main__":
    key = jax.random.PRNGKey(0)
    kernel_sizes = [3, 5, 7]
    embedding_dim = 8
    in_channels = embedding_dim * 3          # = 24, required by the reference forward
    batch, length = 2, 95                    # pads to 98 = 14 * max_k -> n2 = 2

    k_x, k_params = jax.random.split(key)
    x = jax.random.normal(k_x, (batch, in_channels, length), jnp.float32)

    model = SpectralEmbeddingPallas(in_channels, embedding_dim, kernel_sizes, k_params)
    out, returned_len = model(x)
    out = jax.block_until_ready(out)

    assert returned_len == length
    assert out.shape == (batch, embedding_dim, 2), out.shape
    assert bool(jnp.all(jnp.isfinite(out)))
    print("KERNEL_OK")
</pallas_src>

<mosaic_0001>
module attributes {stable_mosaic.version = 11 : i64} {
  func.func @_spectral_fused_kernel(%arg0: i32, %arg1: memref<1x7x2x168xbf16, #tpu.memory_space<vmem>>, %arg2: memref<168x24xbf16, #tpu.memory_space<vmem>>, %arg3: memref<7x24x24xbf16, #tpu.memory_space<vmem>>, %arg4: memref<3x24x8xbf16, #tpu.memory_space<vmem>>, %arg5: memref<1x24xf32, #tpu.memory_space<vmem>>, %arg6: memref<1x24xf32, #tpu.memory_space<vmem>>, %arg7: memref<1x8xf32, #tpu.memory_space<vmem>>, %arg8: memref<1x8xf32, #tpu.memory_space<vmem>>, %arg9: memref<1x2x8xf32, #tpu.memory_space<vmem>>, %arg10: memref<4x24xf32, #tpu.memory_space<vmem>>) attributes {dimension_semantics = [#tpu.dimension_semantics<parallel>], iteration_bounds = array<i64: 2>, scalar_prefetch = 0 : i64, scratch_operands = 1 : i64, tpu.core_type = #tpu.core_type<tc>, window_params = [{transform_indices = @transform_0, window_bounds = array<i64: 1, 7, 2, 168>}, {pipeline_mode = #tpu.pipeline_mode<synchronous>, transform_indices = @transform_1, window_bounds = array<i64: 168, 24>}, {pipeline_mode = #tpu.pipeline_mode<synchronous>, transform_indices = @transform_2, window_bounds = array<i64: 7, 24, 24>}, {pipeline_mode = #tpu.pipeline_mode<synchronous>, transform_indices = @transform_3, window_bounds = array<i64: 3, 24, 8>}, {pipeline_mode = #tpu.pipeline_mode<synchronous>, transform_indices = @transform_4, window_bounds = array<i64: 1, 24>}, {pipeline_mode = #tpu.pipeline_mode<synchronous>, transform_indices = @transform_5, window_bounds = array<i64: 1, 24>}, {pipeline_mode = #tpu.pipeline_mode<synchronous>, transform_indices = @transform_6, window_bounds = array<i64: 1, 8>}, {pipeline_mode = #tpu.pipeline_mode<synchronous>, transform_indices = @transform_7, window_bounds = array<i64: 1, 8>}, {transform_indices = @transform_8, window_bounds = array<i64: 1, 2, 8>}]} {
    %c0 = arith.constant 0 : index
    %c0_0 = arith.constant 0 : index
    %0 = vector.load %arg2[%c0, %c0_0] : memref<168x24xbf16, #tpu.memory_space<vmem>>, vector<168x24xbf16>
    %c0_1 = arith.constant 0 : index
    %c0_2 = arith.constant 0 : index
    %1 = vector.load %arg5[%c0_1, %c0_2] : memref<1x24xf32, #tpu.memory_space<vmem>>, vector<1x24xf32>
    %c0_3 = arith.constant 0 : index
    %c0_4 = arith.constant 0 : index
    %2 = vector.load %arg6[%c0_3, %c0_4] : memref<1x24xf32, #tpu.memory_space<vmem>>, vector<1x24xf32>
    %cst = arith.constant 0.000000e+00 : f32
    %3 = vector.broadcast %cst : f32 to vector<2x24xf32>
    %c0_5 = arith.constant 0 : index
    %c0_6 = arith.constant 0 : index
    %c0_7 = arith.constant 0 : index
    %c0_8 = arith.constant 0 : index
    %4 = vector.load %arg1[%c0_5, %c0_6, %c0_7, %c0_8] : memref<1x7x2x168xbf16, #tpu.memory_space<vmem>>, vector<1x1x2x168xbf16>
    %5 = vector.shape_cast %4 : vector<1x1x2x168xbf16> to vector<2x168xbf16>
    %cst_9 = arith.constant dense<0.000000e+00> : vector<2x24xf32>
    %6 = tpu.matmul %5, %0, %cst_9 {dimension_numbers = #tpu.dot_dimension_numbers<[1], [0], [0], [1], [0, 0, 1, 1], [], []>} : vector<2x168xbf16>, vector<168x24xbf16>, vector<2x24xf32> -> vector<2x24xf32>
    %7 = vector.broadcast %1 : vector<1x24xf32> to vector<2x24xf32>
    %8 = arith.mulf %6, %7 : vector<2x24xf32>
    %9 = vector.broadcast %2 : vector<1x24xf32> to vector<2x24xf32>
    %10 = arith.addf %8, %9 : vector<2x24xf32>
    %cst_10 = arith.constant 5.000000e-01 : f32
    %11 = vector.broadcast %cst_10 : f32 to vector<2x24xf32>
    %12 = arith.mulf %11, %10 : vector<2x24xf32>
    %cst_11 = arith.constant 4.471500e-02 : f32
    %13 = vector.broadcast %cst_11 : f32 to vector<2x24xf32>
    %14 = arith.mulf %13, %10 : vector<2x24xf32>
    %15 = arith.mulf %14, %10 : vector<2x24xf32>
    %16 = arith.mulf %15, %10 : vector<2x24xf32>
    %17 = arith.addf %10, %16 : vector<2x24xf32>
    %cst_12 = arith.constant 0.797884583 : f32
    %18 = vector.broadcast %cst_12 : f32 to vector<2x24xf32>
    %19 = arith.mulf %18, %17 : vector<2x24xf32>
    %20 = math.tanh %19 : vector<2x24xf32>
    %cst_13 = arith.constant 1.000000e+00 : f32
    %21 = vector.broadcast %cst_13 : f32 to vector<2x24xf32>
    %22 = arith.addf %21, %20 : vector<2x24xf32>
    %23 = arith.mulf %12, %22 : vector<2x24xf32>
    %24 = arith.truncf %23 : vector<2x24xf32> to vector<2x24xbf16>
    %c0_14 = arith.constant 0 : index
    %c0_15 = arith.constant 0 : index
    %c0_16 = arith.constant 0 : index
    %25 = vector.load %arg3[%c0_14, %c0_15, %c0_16] : memref<7x24x24xbf16, #tpu.memory_space<vmem>>, vector<1x24x24xbf16>
    %26 = vector.shape_cast %25 : vector<1x24x24xbf16> to vector<24x24xbf16>
    %cst_17 = arith.constant dense<0.000000e+00> : vector<2x24xf32>
    %27 = tpu.matmul %24, %26, %cst_17 {dimension_numbers = #tpu.dot_dimension_numbers<[1], [0], [0], [1], [0, 0, 1, 1], [], []>} : vector<2x24xbf16>, vector<24x24xbf16>, vector<2x24xf32> -> vector<2x24xf32>
    %28 = arith.addf %3, %27 : vector<2x24xf32>
    %c0_18 = arith.constant 0 : index
    %c1 = arith.constant 1 : index
    %c0_19 = arith.constant 0 : index
    %c0_20 = arith.constant 0 : index
    %29 = vector.load %arg1[%c0_18, %c1, %c0_19, %c0_20] : memref<1x7x2x168xbf16, #tpu.memory_space<vmem>>, vector<1x1x2x168xbf16>
    %30 = vector.shape_cast %29 : vector<1x1x2x168xbf16> to vector<2x168xbf16>
    %cst_21 = arith.constant dense<0.000000e+00> : vector<2x24xf32>
    %31 = tpu.matmul %30, %0, %cst_21 {dimension_numbers = #tpu.dot_dimension_numbers<[1], [0], [0], [1], [0, 0, 1, 1], [], []>} : vector<2x168xbf16>, vector<168x24xbf16>, vector<2x24xf32> -> vector<2x24xf32>
    %32 = vector.broadcast %1 : vector<1x24xf32> to vector<2x24xf32>
    %33 = arith.mulf %31, %32 : vector<2x24xf32>
    %34 = vector.broadcast %2 : vector<1x24xf32> to vector<2x24xf32>
    %35 = arith.addf %33, %34 : vector<2x24xf32>
    %cst_22 = arith.constant 5.000000e-01 : f32
    %36 = vector.broadcast %cst_22 : f32 to vector<2x24xf32>
    %37 = arith.mulf %36, %35 : vector<2x24xf32>
    %cst_23 = arith.constant 4.471500e-02 : f32
    %38 = vector.broadcast %cst_23 : f32 to vector<2x24xf32>
    %39 = arith.mulf %38, %35 : vector<2x24xf32>
    %40 = arith.mulf %39, %35 : vector<2x24xf32>
    %41 = arith.mulf %40, %35 : vector<2x24xf32>
    %42 = arith.addf %35, %41 : vector<2x24xf32>
    %cst_24 = arith.constant 0.797884583 : f32
    %43 = vector.broadcast %cst_24 : f32 to vector<2x24xf32>
    %44 = arith.mulf %43, %42 : vector<2x24xf32>
    %45 = math.tanh %44 : vector<2x24xf32>
    %cst_25 = arith.constant 1.000000e+00 : f32
    %46 = vector.broadcast %cst_25 : f32 to vector<2x24xf32>
    %47 = arith.addf %46, %45 : vector<2x24xf32>
    %48 = arith.mulf %37, %47 : vector<2x24xf32>
    %49 = arith.truncf %48 : vector<2x24xf32> to vector<2x24xbf16>
    %c1_26 = arith.constant 1 : index
    %c0_27 = arith.constant 0 : index
    %c0_28 = arith.constant 0 : index
    %50 = vector.load %arg3[%c1_26, %c0_27, %c0_28] : memref<7x24x24xbf16, #tpu.memory_space<vmem>>, vector<1x24x24xbf16>
    %51 = vector.shape_cast %50 : vector<1x24x24xbf16> to vector<24x24xbf16>
    %cst_29 = arith.constant dense<0.000000e+00> : vector<2x24xf32>
    %52 = tpu.matmul %49, %51, %cst_29 {dimension_numbers = #tpu.dot_dimension_numbers<[1], [0], [0], [1], [0, 0, 1, 1], [], []>} : vector<2x24xbf16>, vector<24x24xbf16>, vector<2x24xf32> -> vector<2x24xf32>
    %53 = arith.addf %28, %52 : vector<2x24xf32>
    %c0_30 = arith.constant 0 : index
    %c2 = arith.constant 2 : index
    %c0_31 = arith.constant 0 : index
    %c0_32 = arith.constant 0 : index
    %54 = vector.load %arg1[%c0_30, %c2, %c0_31, %c0_32] : memref<1x7x2x168xbf16, #tpu.memory_space<vmem>>, vector<1x1x2x168xbf16>
    %55 = vector.shape_cast %54 : vector<1x1x2x168xbf16> to vector<2x168xbf16>
    %cst_33 = arith.constant dense<0.000000e+00> : vector<2x24xf32>
    %56 = tpu.matmul %55, %0, %cst_33 {dimension_numbers = #tpu.dot_dimension_numbers<[1], [0], [0], [1], [0, 0, 1, 1], [], []>} : vector<2x168xbf16>, vector<168x24xbf16>, vector<2x24xf32> -> vector<2x24xf32>
    %57 = vector.broadcast %1 : vector<1x24xf32> to vector<2x24xf32>
    %58 = arith.mulf %56, %57 : vector<2x24xf32>
    %59 = vector.broadcast %2 : vector<1x24xf32> to vector<2x24xf32>
    %60 = arith.addf %58, %59 : vector<2x24xf32>
    %cst_34 = arith.constant 5.000000e-01 : f32
    %61 = vector.broadcast %cst_34 : f32 to vector<2x24xf32>
    %62 = arith.mulf %61, %60 : vector<2x24xf32>
    %cst_35 = arith.constant 4.471500e-02 : f32
    %63 = vector.broadcast %cst_35 : f32 to vector<2x24xf32>
    %64 = arith.mulf %63, %60 : vector<2x24xf32>
    %65 = arith.mulf %64, %60 : vector<2x24xf32>
    %66 = arith.mulf %65, %60 : vector<2x24xf32>
    %67 = arith.addf %60, %66 : vector<2x24xf32>
    %cst_36 = arith.constant 0.797884583 : f32
    %68 = vector.broadcast %cst_36 : f32 to vector<2x24xf32>
    %69 = arith.mulf %68, %67 : vector<2x24xf32>
    %70 = math.tanh %69 : vector<2x24xf32>
    %cst_37 = arith.constant 1.000000e+00 : f32
    %71 = vector.broadcast %cst_37 : f32 to vector<2x24xf32>
    %72 = arith.addf %71, %70 : vector<2x24xf32>
    %73 = arith.mulf %62, %72 : vector<2x24xf32>
    %74 = arith.truncf %73 : vector<2x24xf32> to vector<2x24xbf16>
    %c2_38 = arith.constant 2 : index
    %c0_39 = arith.constant 0 : index
    %c0_40 = arith.constant 0 : index
    %75 = vector.load %arg3[%c2_38, %c0_39, %c0_40] : memref<7x24x24xbf16, #tpu.memory_space<vmem>>, vector<1x24x24xbf16>
    %76 = vector.shape_cast %75 : vector<1x24x24xbf16> to vector<24x24xbf16>
    %cst_41 = arith.constant dense<0.000000e+00> : vector<2x24xf32>
    %77 = tpu.matmul %74, %76, %cst_41 {dimension_numbers = #tpu.dot_dimension_numbers<[1], [0], [0], [1], [0, 0, 1, 1], [], []>} : vector<2x24xbf16>, vector<24x24xbf16>, vector<2x24xf32> -> vector<2x24xf32>
    %78 = arith.addf %53, %77 : vector<2x24xf32>
    %c0_42 = arith.constant 0 : index
    %c3 = arith.constant 3 : index
    %c0_43 = arith.constant 0 : index
    %c0_44 = arith.constant 0 : index
    %79 = vector.load %arg1[%c0_42, %c3, %c0_43, %c0_44] : memref<1x7x2x168xbf16, #tpu.memory_space<vmem>>, vector<1x1x2x168xbf16>
    %80 = vector.shape_cast %79 : vector<1x1x2x168xbf16> to vector<2x168xbf16>
    %cst_45 = arith.constant dense<0.000000e+00> : vector<2x24xf32>
    %81 = tpu.matmul %80, %0, %cst_45 {dimension_numbers = #tpu.dot_dimension_numbers<[1], [0], [0], [1], [0, 0, 1, 1], [], []>} : vector<2x168xbf16>, vector<168x24xbf16>, vector<2x24xf32> -> vector<2x24xf32>
    %82 = vector.broadcast %1 : vector<1x24xf32> to vector<2x24xf32>
    %83 = arith.mulf %81, %82 : vector<2x24xf32>
    %84 = vector.broadcast %2 : vector<1x24xf32> to vector<2x24xf32>
    %85 = arith.addf %83, %84 : vector<2x24xf32>
    %cst_46 = arith.constant 5.000000e-01 : f32
    %86 = vector.broadcast %cst_46 : f32 to vector<2x24xf32>
    %87 = arith.mulf %86, %85 : vector<2x24xf32>
    %cst_47 = arith.constant 4.471500e-02 : f32
    %88 = vector.broadcast %cst_47 : f32 to vector<2x24xf32>
    %89 = arith.mulf %88, %85 : vector<2x24xf32>
    %90 = arith.mulf %89, %85 : vector<2x24xf32>
    %91 = arith.mulf %90, %85 : vector<2x24xf32>
    %92 = arith.addf %85, %91 : vector<2x24xf32>
    %cst_48 = arith.constant 0.797884583 : f32
    %93 = vector.broadcast %cst_48 : f32 to vector<2x24xf32>
    %94 = arith.mulf %93, %92 : vector<2x24xf32>
    %95 = math.tanh %94 : vector<2x24xf32>
    %cst_49 = arith.constant 1.000000e+00 : f32
    %96 = vector.broadcast %cst_49 : f32 to vector<2x24xf32>
    %97 = arith.addf %96, %95 : vector<2x24xf32>
    %98 = arith.mulf %87, %97 : vector<2x24xf32>
    %99 = arith.truncf %98 : vector<2x24xf32> to vector<2x24xbf16>
    %c3_50 = arith.constant 3 : index
    %c0_51 = arith.constant 0 : index
    %c0_52 = arith.constant 0 : index
    %100 = vector.load %arg3[%c3_50, %c0_51, %c0_52] : memref<7x24x24xbf16, #tpu.memory_space<vmem>>, vector<1x24x24xbf16>
    %101 = vector.shape_cast %100 : vector<1x24x24xbf16> to vector<24x24xbf16>
    %cst_53 = arith.constant dense<0.000000e+00> : vector<2x24xf32>
    %102 = tpu.matmul %99, %101, %cst_53 {dimension_numbers = #tpu.dot_dimension_numbers<[1], [0], [0], [1], [0, 0, 1, 1], [], []>} : vector<2x24xbf16>, vector<24x24xbf16>, vector<2x24xf32> -> vector<2x24xf32>
    %103 = arith.addf %78, %102 : vector<2x24xf32>
    %c0_54 = arith.constant 0 : index
    %c4 = arith.constant 4 : index
    %c0_55 = arith.constant 0 : index
    %c0_56 = arith.constant 0 : index
    %104 = vector.load %arg1[%c0_54, %c4, %c0_55, %c0_56] : memref<1x7x2x168xbf16, #tpu.memory_space<vmem>>, vector<1x1x2x168xbf16>
    %105 = vector.shape_cast %104 : vector<1x1x2x168xbf16> to vector<2x168xbf16>
    %cst_57 = arith.constant dense<0.000000e+00> : vector<2x24xf32>
    %106 = tpu.matmul %105, %0, %cst_57 {dimension_numbers = #tpu.dot_dimension_numbers<[1], [0], [0], [1], [0, 0, 1, 1], [], []>} : vector<2x168xbf16>, vector<168x24xbf16>, vector<2x24xf32> -> vector<2x24xf32>
    %107 = vector.broadcast %1 : vector<1x24xf32> to vector<2x24xf32>
    %108 = arith.mulf %106, %107 : vector<2x24xf32>
    %109 = vector.broadcast %2 : vector<1x24xf32> to vector<2x24xf32>
    %110 = arith.addf %108, %109 : vector<2x24xf32>
    %cst_58 = arith.constant 5.000000e-01 : f32
    %111 = vector.broadcast %cst_58 : f32 to vector<2x24xf32>
    %112 = arith.mulf %111, %110 : vector<2x24xf32>
    %cst_59 = arith.constant 4.471500e-02 : f32
    %113 = vector.broadcast %cst_59 : f32 to vector<2x24xf32>
    %114 = arith.mulf %113, %110 : vector<2x24xf32>
    %115 = arith.mulf %114, %110 : vector<2x24xf32>
    %116 = arith.mulf %115, %110 : vector<2x24xf32>
    %117 = arith.addf %110, %116 : vector<2x24xf32>
    %cst_60 = arith.constant 0.797884583 : f32
    %118 = vector.broadcast %cst_60 : f32 to vector<2x24xf32>
    %119 = arith.mulf %118, %117 : vector<2x24xf32>
    %120 = math.tanh %119 : vector<2x24xf32>
    %cst_61 = arith.constant 1.000000e+00 : f32
    %121 = vector.broadcast %cst_61 : f32 to vector<2x24xf32>
    %122 = arith.addf %121, %120 : vector<2x24xf32>
    %123 = arith.mulf %112, %122 : vector<2x24xf32>
    %124 = arith.truncf %123 : vector<2x24xf32> to vector<2x24xbf16>
    %c4_62 = arith.constant 4 : index
    %c0_63 = arith.constant 0 : index
    %c0_64 = arith.constant 0 : index
    %125 = vector.load %arg3[%c4_62, %c0_63, %c0_64] : memref<7x24x24xbf16, #tpu.memory_space<vmem>>, vector<1x24x24xbf16>
    %126 = vector.shape_cast %125 : vector<1x24x24xbf16> to vector<24x24xbf16>
    %cst_65 = arith.constant dense<0.000000e+00> : vector<2x24xf32>
    %127 = tpu.matmul %124, %126, %cst_65 {dimension_numbers = #tpu.dot_dimension_numbers<[1], [0], [0], [1], [0, 0, 1, 1], [], []>} : vector<2x24xbf16>, vector<24x24xbf16>, vector<2x24xf32> -> vector<2x24xf32>
    %128 = arith.addf %103, %127 : vector<2x24xf32>
    %c0_66 = arith.constant 0 : index
    %c5 = arith.constant 5 : index
    %c0_67 = arith.constant 0 : index
    %c0_68 = arith.constant 0 : index
    %129 = vector.load %arg1[%c0_66, %c5, %c0_67, %c0_68] : memref<1x7x2x168xbf16, #tpu.memory_space<vmem>>, vector<1x1x2x168xbf16>
    %130 = vector.shape_cast %129 : vector<1x1x2x168xbf16> to vector<2x168xbf16>
    %cst_69 = arith.constant dense<0.000000e+00> : vector<2x24xf32>
    %131 = tpu.matmul %130, %0, %cst_69 {dimension_numbers = #tpu.dot_dimension_numbers<[1], [0], [0], [1], [0, 0, 1, 1], [], []>} : vector<2x168xbf16>, vector<168x24xbf16>, vector<2x24xf32> -> vector<2x24xf32>
    %132 = vector.broadcast %1 : vector<1x24xf32> to vector<2x24xf32>
    %133 = arith.mulf %131, %132 : vector<2x24xf32>
    %134 = vector.broadcast %2 : vector<1x24xf32> to vector<2x24xf32>
    %135 = arith.addf %133, %134 : vector<2x24xf32>
    %cst_70 = arith.constant 5.000000e-01 : f32
    %136 = vector.broadcast %cst_70 : f32 to vector<2x24xf32>
    %137 = arith.mulf %136, %135 : vector<2x24xf32>
    %cst_71 = arith.constant 4.471500e-02 : f32
    %138 = vector.broadcast %cst_71 : f32 to vector<2x24xf32>
    %139 = arith.mulf %138, %135 : vector<2x24xf32>
    %140 = arith.mulf %139, %135 : vector<2x24xf32>
    %141 = arith.mulf %140, %135 : vector<2x24xf32>
    %142 = arith.addf %135, %141 : vector<2x24xf32>
    %cst_72 = arith.constant 0.797884583 : f32
    %143 = vector.broadcast %cst_72 : f32 to vector<2x24xf32>
    %144 = arith.mulf %143, %142 : vector<2x24xf32>
    %145 = math.tanh %144 : vector<2x24xf32>
    %cst_73 = arith.constant 1.000000e+00 : f32
    %146 = vector.broadcast %cst_73 : f32 to vector<2x24xf32>
    %147 = arith.addf %146, %145 : vector<2x24xf32>
    %148 = arith.mulf %137, %147 : vector<2x24xf32>
    %149 = arith.truncf %148 : vector<2x24xf32> to vector<2x24xbf16>
    %c5_74 = arith.constant 5 : index
    %c0_75 = arith.constant 0 : index
    %c0_76 = arith.constant 0 : index
    %150 = vector.load %arg3[%c5_74, %c0_75, %c0_76] : memref<7x24x24xbf16, #tpu.memory_space<vmem>>, vector<1x24x24xbf16>
    %151 = vector.shape_cast %150 : vector<1x24x24xbf16> to vector<24x24xbf16>
    %cst_77 = arith.constant dense<0.000000e+00> : vector<2x24xf32>
    %152 = tpu.matmul %149, %151, %cst_77 {dimension_numbers = #tpu.dot_dimension_numbers<[1], [0], [0], [1], [0, 0, 1, 1], [], []>} : vector<2x24xbf16>, vector<24x24xbf16>, vector<2x24xf32> -> vector<2x24xf32>
    %153 = arith.addf %128, %152 : vector<2x24xf32>
    %c0_78 = arith.constant 0 : index
    %c6 = arith.constant 6 : index
    %c0_79 = arith.constant 0 : index
    %c0_80 = arith.constant 0 : index
    %154 = vector.load %arg1[%c0_78, %c6, %c0_79, %c0_80] : memref<1x7x2x168xbf16, #tpu.memory_space<vmem>>, vector<1x1x2x168xbf16>
    %155 = vector.shape_cast %154 : vector<1x1x2x168xbf16> to vector<2x168xbf16>
    %cst_81 = arith.constant dense<0.000000e+00> : vector<2x24xf32>
    %156 = tpu.matmul %155, %0, %cst_81 {dimension_numbers = #tpu.dot_dimension_numbers<[1], [0], [0], [1], [0, 0, 1, 1], [], []>} : vector<2x168xbf16>, vector<168x24xbf16>, vector<2x24xf32> -> vector<2x24xf32>
    %157 = vector.broadcast %1 : vector<1x24xf32> to vector<2x24xf32>
    %158 = arith.mulf %156, %157 : vector<2x24xf32>
    %159 = vector.broadcast %2 : vector<1x24xf32> to vector<2x24xf32>
    %160 = arith.addf %158, %159 : vector<2x24xf32>
    %cst_82 = arith.constant 5.000000e-01 : f32
    %161 = vector.broadcast %cst_82 : f32 to vector<2x24xf32>
    %162 = arith.mulf %161, %160 : vector<2x24xf32>
    %cst_83 = arith.constant 4.471500e-02 : f32
    %163 = vector.broadcast %cst_83 : f32 to vector<2x24xf32>
    %164 = arith.mulf %163, %160 : vector<2x24xf32>
    %165 = arith.mulf %164, %160 : vector<2x24xf32>
    %166 = arith.mulf %165, %160 : vector<2x24xf32>
    %167 = arith.addf %160, %166 : vector<2x24xf32>
    %cst_84 = arith.constant 0.797884583 : f32
    %168 = vector.broadcast %cst_84 : f32 to vector<2x24xf32>
    %169 = arith.mulf %168, %167 : vector<2x24xf32>
    %170 = math.tanh %169 : vector<2x24xf32>
    %cst_85 = arith.constant 1.000000e+00 : f32
    %171 = vector.broadcast %cst_85 : f32 to vector<2x24xf32>
    %172 = arith.addf %171, %170 : vector<2x24xf32>
    %173 = arith.mulf %162, %172 : vector<2x24xf32>
    %174 = arith.truncf %173 : vector<2x24xf32> to vector<2x24xbf16>
    %c6_86 = arith.constant 6 : index
    %c0_87 = arith.constant 0 : index
    %c0_88 = arith.constant 0 : index
    %175 = vector.load %arg3[%c6_86, %c0_87, %c0_88] : memref<7x24x24xbf16, #tpu.memory_space<vmem>>, vector<1x24x24xbf16>
    %176 = vector.shape_cast %175 : vector<1x24x24xbf16> to vector<24x24xbf16>
    %cst_89 = arith.constant dense<0.000000e+00> : vector<2x24xf32>
    %177 = tpu.matmul %174, %176, %cst_89 {dimension_numbers = #tpu.dot_dimension_numbers<[1], [0], [0], [1], [0, 0, 1, 1], [], []>} : vector<2x24xbf16>, vector<24x24xbf16>, vector<2x24xf32> -> vector<2x24xf32>
    %178 = arith.addf %153, %177 : vector<2x24xf32>
    %179 = vector.broadcast %1 : vector<1x24xf32> to vector<2x24xf32>
    %180 = arith.mulf %178, %179 : vector<2x24xf32>
    %181 = vector.broadcast %2 : vector<1x24xf32> to vector<2x24xf32>
    %182 = arith.addf %180, %181 : vector<2x24xf32>
    %cst_90 = arith.constant 5.000000e-01 : f32
    %183 = vector.broadcast %cst_90 : f32 to vector<2x24xf32>
    %184 = arith.mulf %183, %182 : vector<2x24xf32>
    %cst_91 = arith.constant 4.471500e-02 : f32
    %185 = vector.broadcast %cst_91 : f32 to vector<2x24xf32>
    %186 = arith.mulf %185, %182 : vector<2x24xf32>
    %187 = arith.mulf %186, %182 : vector<2x24xf32>
    %188 = arith.mulf %187, %182 : vector<2x24xf32>
    %189 = arith.addf %182, %188 : vector<2x24xf32>
    %cst_92 = arith.constant 0.797884583 : f32
    %190 = vector.broadcast %cst_92 : f32 to vector<2x24xf32>
    %191 = arith.mulf %190, %189 : vector<2x24xf32>
    %192 = math.tanh %191 : vector<2x24xf32>
    %cst_93 = arith.constant 1.000000e+00 : f32
    %193 = vector.broadcast %cst_93 : f32 to vector<2x24xf32>
    %194 = arith.addf %193, %192 : vector<2x24xf32>
    %195 = arith.mulf %184, %194 : vector<2x24xf32>
    %cst_94 = arith.constant 0.000000e+00 : f32
    %196 = vector.broadcast %cst_94 : f32 to vector<4x24xf32>
    %c0_95 = arith.constant 0 : index
    %c0_96 = arith.constant 0 : index
    %197 = vector.load %arg10[%c0_95, %c0_96] : memref<4x24xf32, #tpu.memory_space<vmem>>, vector<4x24xf32>
    tpu.vector_store %arg10[%c0_95, %c0_96], %196 {strides = array<i32>} : memref<4x24xf32, #tpu.memory_space<vmem>>, vector<4x24xf32>,
    %c1_97 = arith.constant 1 : index
    %c0_98 = arith.constant 0 : index
    %198 = vector.load %arg10[%c1_97, %c0_98] : memref<4x24xf32, #tpu.memory_space<vmem>>, vector<2x24xf32>
    tpu.vector_store %arg10[%c1_97, %c0_98], %195 {strides = array<i32>} : memref<4x24xf32, #tpu.memory_space<vmem>>, vector<2x24xf32>,
    %cst_99 = arith.constant 0.000000e+00 : f32
    %199 = vector.broadcast %cst_99 : f32 to vector<2x8xf32>
    %c0_100 = arith.constant 0 : index
    %c0_101 = arith.constant 0 : index
    %200 = vector.load %arg10[%c0_100, %c0_101] : memref<4x24xf32, #tpu.memory_space<vmem>>, vector<2x24xf32>
    %201 = arith.truncf %200 : vector<2x24xf32> to vector<2x24xbf16>
    %c0_102 = arith.constant 0 : index
    %c0_103 = arith.constant 0 : index
    %c0_104 = arith.constant 0 : index
    %202 = vector.load %arg4[%c0_102, %c0_103, %c0_104] : memref<3x24x8xbf16, #tpu.memory_space<vmem>>, vector<1x24x8xbf16>
    %203 = vector.shape_cast %202 : vector<1x24x8xbf16> to vector<24x8xbf16>
    %cst_105 = arith.constant dense<0.000000e+00> : vector<2x8xf32>
    %204 = tpu.matmul %201, %203, %cst_105 {dimension_numbers = #tpu.dot_dimension_numbers<[1], [0], [0], [1], [0, 0, 1, 1], [], []>} : vector<2x24xbf16>, vector<24x8xbf16>, vector<2x8xf32> -> vector<2x8xf32>
    %205 = arith.addf %199, %204 : vector<2x8xf32>
    %c1_106 = arith.constant 1 : index
    %c0_107 = arith.constant 0 : index
    %206 = vector.load %arg10[%c1_106, %c0_107] : memref<4x24xf32, #tpu.memory_space<vmem>>, vector<2x24xf32>
    %207 = arith.truncf %206 : vector<2x24xf32> to vector<2x24xbf16>
    %c1_108 = arith.constant 1 : index
    %c0_109 = arith.constant 0 : index
    %c0_110 = arith.constant 0 : index
    %208 = vector.load %arg4[%c1_108, %c0_109, %c0_110] : memref<3x24x8xbf16, #tpu.memory_space<vmem>>, vector<1x24x8xbf16>
    %209 = vector.shape_cast %208 : vector<1x24x8xbf16> to vector<24x8xbf16>
    %cst_111 = arith.constant dense<0.000000e+00> : vector<2x8xf32>
    %210 = tpu.matmul %207, %209, %cst_111 {dimension_numbers = #tpu.dot_dimension_numbers<[1], [0], [0], [1], [0, 0, 1, 1], [], []>} : vector<2x24xbf16>, vector<24x8xbf16>, vector<2x8xf32> -> vector<2x8xf32>
    %211 = arith.addf %205, %210 : vector<2x8xf32>
    %c2_112 = arith.constant 2 : index
    %c0_113 = arith.constant 0 : index
    %212 = vector.load %arg10[%c2_112, %c0_113] : memref<4x24xf32, #tpu.memory_space<vmem>>, vector<2x24xf32>
    %213 = arith.truncf %212 : vector<2x24xf32> to vector<2x24xbf16>
    %c2_114 = arith.constant 2 : index
    %c0_115 = arith.constant 0 : index
    %c0_116 = arith.constant 0 : index
    %214 = vector.load %arg4[%c2_114, %c0_115, %c0_116] : memref<3x24x8xbf16, #tpu.memory_space<vmem>>, vector<1x24x8xbf16>
    %215 = vector.shape_cast %214 : vector<1x24x8xbf16> to vector<24x8xbf16>
    %cst_117 = arith.constant dense<0.000000e+00> : vector<2x8xf32>
    %216 = tpu.matmul %213, %215, %cst_117 {dimension_numbers = #tpu.dot_dimension_numbers<[1], [0], [0], [1], [0, 0, 1, 1], [], []>} : vector<2x24xbf16>, vector<24x8xbf16>, vector<2x8xf32> -> vector<2x8xf32>
    %217 = arith.addf %211, %216 : vector<2x8xf32>
    %c0_118 = arith.constant 0 : index
    %c0_119 = arith.constant 0 : index
    %218 = vector.load %arg7[%c0_118, %c0_119] : memref<1x8xf32, #tpu.memory_space<vmem>>, vector<1x8xf32>
    %219 = vector.broadcast %218 : vector<1x8xf32> to vector<2x8xf32>
    %220 = arith.mulf %217, %219 : vector<2x8xf32>
    %c0_120 = arith.constant 0 : index
    %c0_121 = arith.constant 0 : index
    %221 = vector.load %arg8[%c0_120, %c0_121] : memref<1x8xf32, #tpu.memory_space<vmem>>, vector<1x8xf32>
    %222 = vector.broadcast %221 : vector<1x8xf32> to vector<2x8xf32>
    %223 = arith.addf %220, %222 : vector<2x8xf32>
    %cst_122 = arith.constant 5.000000e-01 : f32
    %224 = vector.broadcast %cst_122 : f32 to vector<2x8xf32>
    %225 = arith.mulf %224, %223 : vector<2x8xf32>
    %cst_123 = arith.constant 4.471500e-02 : f32
    %226 = vector.broadcast %cst_123 : f32 to vector<2x8xf32>
    %227 = arith.mulf %226, %223 : vector<2x8xf32>
    %228 = arith.mulf %227, %223 : vector<2x8xf32>
    %229 = arith.mulf %228, %223 : vector<2x8xf32>
    %230 = arith.addf %223, %229 : vector<2x8xf32>
    %cst_124 = arith.constant 0.797884583 : f32
    %231 = vector.broadcast %cst_124 : f32 to vector<2x8xf32>
    %232 = arith.mulf %231, %230 : vector<2x8xf32>
    %233 = math.tanh %232 : vector<2x8xf32>
    %cst_125 = arith.constant 1.000000e+00 : f32
    %234 = vector.broadcast %cst_125 : f32 to vector<2x8xf32>
    %235 = arith.addf %234, %233 : vector<2x8xf32>
    %236 = arith.mulf %225, %235 : vector<2x8xf32>
    %c0_126 = arith.constant 0 : index
    %c0_127 = arith.constant 0 : index
    %c0_128 = arith.constant 0 : index
    %237 = vector.load %arg9[%c0_126, %c0_127, %c0_128] : memref<1x2x8xf32, #tpu.memory_space<vmem>>, vector<1x2x8xf32>
    %238 = vector.shape_cast %237 : vector<1x2x8xf32> to vector<2x8xf32>
    %239 = vector.shape_cast %236 : vector<2x8xf32> to vector<1x2x8xf32>
    tpu.vector_store %arg9[%c0_126, %c0_127, %c0_128], %239 {strides = array<i32>} : memref<1x2x8xf32, #tpu.memory_space<vmem>>, vector<1x2x8xf32>,
    return
  }
  func.func @transform_0(%arg0: i32) -> (i32, i32, i32, i32) {
    %c0_i32 = arith.constant 0 : i32
    %c0_i32_0 = arith.constant 0 : i32
    %c0_i32_1 = arith.constant 0 : i32
    %c0_i32_2 = arith.constant 0 : i32
    return %arg0, %c0_i32, %c0_i32_0, %c0_i32_1 : i32, i32, i32, i32
  }
  func.func @transform_1(%arg0: i32) -> (i32, i32) {
    %c0_i32 = arith.constant 0 : i32
    %c0_i32_0 = arith.constant 0 : i32
    %c0_i32_1 = arith.constant 0 : i32
    return %c0_i32, %c0_i32_0 : i32, i32
  }
  func.func @transform_2(%arg0: i32) -> (i32, i32, i32) {
    %c0_i32 = arith.constant 0 : i32
    %c0_i32_0 = arith.constant 0 : i32
    %c0_i32_1 = arith.constant 0 : i32
    %c0_i32_2 = arith.constant 0 : i32
    return %c0_i32, %c0_i32_0, %c0_i32_1 : i32, i32, i32
  }
  func.func @transform_3(%arg0: i32) -> (i32, i32, i32) {
    %c0_i32 = arith.constant 0 : i32
    %c0_i32_0 = arith.constant 0 : i32
    %c0_i32_1 = arith.constant 0 : i32
    %c0_i32_2 = arith.constant 0 : i32
    return %c0_i32, %c0_i32_0, %c0_i32_1 : i32, i32, i32
  }
  func.func @transform_4(%arg0: i32) -> (i32, i32) {
    %c0_i32 = arith.constant 0 : i32
    %c0_i32_0 = arith.constant 0 : i32
    %c0_i32_1 = arith.constant 0 : i32
    return %c0_i32, %c0_i32_0 : i32, i32
  }
  func.func @transform_5(%arg0: i32) -> (i32, i32) {
    %c0_i32 = arith.constant 0 : i32
    %c0_i32_0 = arith.constant 0 : i32
    %c0_i32_1 = arith.constant 0 : i32
    return %c0_i32, %c0_i32_0 : i32, i32
  }
  func.func @transform_6(%arg0: i32) -> (i32, i32) {
    %c0_i32 = arith.constant 0 : i32
    %c0_i32_0 = arith.constant 0 : i32
    %c0_i32_1 = arith.constant 0 : i32
    return %c0_i32, %c0_i32_0 : i32, i32
  }
  func.func @transform_7(%arg0: i32) -> (i32, i32) {
    %c0_i32 = arith.constant 0 : i32
    %c0_i32_0 = arith.constant 0 : i32
    %c0_i32_1 = arith.constant 0 : i32
    return %c0_i32, %c0_i32_0 : i32, i32
  }
  func.func @transform_8(%arg0: i32) -> (i32, i32, i32) {
    %c0_i32 = arith.constant 0 : i32
    %c0_i32_0 = arith.constant 0 : i32
    %c0_i32_1 = arith.constant 0 : i32
    return %arg0, %c0_i32, %c0_i32_0 : i32, i32, i32
  }
}

</mosaic_0001>

<bundles_post_ra>
// kernel: _forward_impl.1
= control target key start
LH: loop header
LB: loop body
LE: loop exit
PB: predicated region body
PF: predicated region fallthrough
CT: control target
= control target key end

     0   :  { %13 = vsyncpa [#allocation4], 0  ;;  %s2582_s0 = inlined_call_operand.vmem [shape: bf16[2,7,2,168], index: 0, kind: input, shape index: {}]   ;;  %s2583_s1 = inlined_call_operand.vmem [shape: bf16[168,24], index: 1, kind: input, shape index: {}]   ;;  %s2584_s2 = inlined_call_operand.vmem [shape: bf16[7,24,24], index: 2, kind: input, shape index: {}]   ;;  %s2585_s3 = inlined_call_operand.vmem [shape: bf16[3,24,8], index: 3, kind: input, shape index: {}]   ;;  %s2586_s4 = inlined_call_operand.vmem [shape: f32[1,24], index: 4, kind: input, shape index: {}]   ;;  %s2587_s5 = inlined_call_operand.vmem [shape: f32[1,24], index: 5, kind: input, shape index: {}]   ;;  %s2588_s6 = inlined_call_operand.vmem [shape: f32[1,8], index: 6, kind: input, shape index: {}]   ;;  %s2589_s7 = inlined_call_operand.vmem [shape: f32[1,8], index: 7, kind: input, shape index: {}]   ;;  %s2590_s8 = inlined_call_operand.hbm [shape: f32[2,2,8], index: 8, kind: output, shape index: {}]  }
   0x1   :  { %15 = vsyncpa [#allocation4 + $0x1], 0  ;;  %s2100_s27 = smov 0   ;;  %s2102_s28 = smov 0  }
   0x2   :  { %s2104_s29 = smov 0   ;;  %s2106_s30 = smov 0  }
   0x3 LB: > { %s2121_s9 = sadd.s32 4294967295, %s2048_s30   ;;  %s1687_s10 = sadd.s32 4294967294, %s2048_s30   ;;  %s2048_s30 = sphi %s2106_s30, %s2596_s30   ;;  %s2044_s29 = sphi %s2104_s29, %s2595_s29   ;;  %s2040_s28 = sphi %s2102_s28, %s2594_s28   ;;  %s2036_s27 = sphi %s2100_s27, %s2593_s27  }
   0x4   : > { %s2125_s11 = sadd.s32 1, %s2048_s30   ;;  %s201_s12 = sadd.s32 1, %s2044_s29 }
   0x5   : > { %s198_s13 = ssub.s32 %s2048_s30, %s2125_s11  ;;  %p211_p0 = scmp.ne.s32.totalorder %s2044_s29, %s2040_s28 }
   0x6   : > { %p199_p1 = scmp.eq.s32.totalorder %s198_s13, 0  ;;  %p212_p2 = scmp.eq.s32.totalorder %s2121_s9, 1 }
   0x7   : > { %p217_p3 = scmp.ne.s32.totalorder %s2040_s28, %s2036_s27  ;;  %p218_p4 = scmp.eq.s32.totalorder %s1687_s10, 1 }
   0x8   : > { %s2136_s14 = scalar_select %p199_p1, %s2044_s29, %s201_s12  }
   0x9   : > { %p2138_p5 = por %p212_p2, %p211_p0  ;;  %p2142_p6 = por %p218_p4, %p217_p3 }
   0xa   : > { %p1690_p7 = scmp.ge.s32.totalorder %s2048_s30, 1  ;;  %p264_p8 = scmp.lt.s32.totalorder %s2048_s30, 3 }
   0xc   : > { %p265_p9 = pnand %p1690_p7, %p264_p8 }
   0xd   : > { %p297_p10 = scmp.lt.s32.totalorder (!%p265_p9), %s2121_s9, 1  ;;  %s294_s17 = sand.u32 (!%p265_p9), 1, %s2040_s28  }
   0xe   : > { %268 = sbr.rel (%p265_p9) target bundleno = 1912 (0x778), region = 52  ;;  %s1691_s18 = sshll.u32 (!%p265_p9), %s294_s17, 1 }
   0xf   : > { %s1782_s19 = sshll.u32 (!%p265_p9), %s2121_s9, 5  ;;  %s296_s20 = scalar_lea.vmem (!%p265_p9), [#allocation3], %s1691_s18 }
  0x10   : > { %s1626_s23 = scalar_lea.hbm (!%p265_p9), %s2590_s8, %s1782_s19  ;;  %s2054_s26 = smov (!%p265_p9), [#allocation3]  }
  0x13   : > { %v2151_v0 = vld [vmem:[%s2583_s1 + $0x38] sm:$0xff]   ;;  %v2050_v1 = vmov 0   ;;  %v2160_v2 = vld [vmem:[%s2583_s1 + $0x30] sm:$0xff]   ;;  %s298_s21 = scalar_select %p297_p10, %s2121_s9, 1  ;;  %v2171_v3 = vld [vmem:[%s2583_s1 + $0x28] sm:$0xff]   ;;  %v338_v4 = vlaneseq  ;;  %vm413_vm0 = vcmask 326656  }
  0x14   : > { %421 = vmatprep.subr.bf16.mxu0 %v2050_v1  ;;  %517 = vmatprep.subr.bf16.mxu1 %v2050_v1  ;;  %v2185_v5 = vld [vmem:[%s2583_s1 + $0x20] sm:$0xff]   ;;  %v2051_v7 = vmov 1966171168   ;;  %v2194_v11 = vld [vmem:[%s2583_s1 + $0x18] sm:$0xff]   ;;  %v2205_v16 = vld [vmem:[%s2583_s1 + $0x10] sm:$0xff]   ;;  %vm417_vm1 = vcmask 1043456  }
  0x15   : > { %422 = vmatpush1.bf16.msra.mxu0 %v2151_v0  ;;  %518 = vmatpush1.bf16.msra.mxu1 %v2151_v0  ;;  %s1895_s24 = smul.u32 14, %s298_s21  ;;  %v336_v8 = vunpack.c.l.s4 %v2051_v7  ;;  %v339_v9 = vshrl.u32 %v338_v4, 7  ;;  %v2216_v19 = vld [vmem:[%s2583_s1 + $0x8] sm:$0xff]   ;;  %v2229_v20 = vld [vmem:[%s2583_s1] sm:$0xff]   ;;  %v1947_v21 = vld [vmem:[%s2583_s1 + $0x50] ss:$0 sps:$4 sm:$0xff]  }
  0x16   : > { %423 = vmatprep.subr.bf16.mxu0 %v2050_v1  ;;  %519 = vmatprep.subr.bf16.mxu1 %v2050_v1  ;;  %v2241_v22 = vsel %vm417_vm1, %v1947_v21, 0  ;;  %v2248_v23 = vld [vmem:[%s2583_s1 + $0x48] sm:$0xff]   ;;  %v2258_v25 = vld [vmem:[%s2583_s1 + $0x40] sm:$0xff]   ;;  %v1950_v31 = vld [vmem:[%s2584_s2 + $0x14] ss:$0 sps:$4 sm:$0xff]   ;;  %v2052_v32 = vmov 0.0  }
  0x17   : > { %s2178_s10 = scalar_lea.vmem %s2582_s0, %s1895_s24  ;;  %v337_v13 = vunpack.c.0.s8 %v336_v8  ;;  %vm2053_vm2 = vmmov 0   ;;  %v587_v33 = vsel %vm417_vm1, %v1950_v31, 0  ;;  %v1951_v34 = vld [vmem:[%s2584_s2 + $0xc] sm:$0xff]   ;;  %v2309_v35 = vld [vmem:[%s2586_s4] ss:$0 sm:$0xff]  ;;  %vm582_vm3 = vcmask 195584  }
  0x18   : > { %v1692_v6 = vld.sshfl [vmem:[%s2178_s10] sm:$0x11 pattern:$0x75316420]  ;;  %v1952_v62 = vld [vmem:[%s2584_s2 + $0x8] ss:$0 sps:$4 sm:$0xff]  }
  0x19   : > { %424 = vmatpush1.bf16.msra.mxu0 %v2160_v2  ;;  %520 = vmatpush1.bf16.msra.mxu1 %v2160_v2  ;;  %v1708_v10 = vld.sshfl [vmem:[%s2178_s10 + $0x2] sm:$0x11 pattern:$0x75316420]  ;;  %v334_v12 = vcombine.high %v1692_v6, %v1692_v6  ;;  %v2200_v15 = vsub.s32 %v337_v13, %v339_v9  ;;  %v2314_v36 = vld [vmem:[%s2587_s5] ss:$0 sm:$0xff] }
  0x1a   : > { %425 = vmatprep.subr.bf16.mxu0 %v2050_v1  ;;  %521 = vmatprep.subr.bf16.mxu1 %v2050_v1  ;;  %v498_v14 = vcombine.high %v1708_v10, %v1708_v10  ;;  %v1720_v24 = vld.sshfl [vmem:[%s2178_s10 + $0x4] sm:$0x11 pattern:$0x75316420]  ;;  %v642_v7 = vsel %vm417_vm1, %v1952_v62, 0  ;;  %vm1400_vm4 = vcmask 191488  }
  0x1b   : > { %v348_v17 = vrot.slane %v334_v12, %v2200_v15  ;;  %v694_v26 = vcombine.high %v1720_v24, %v1720_v24  ;;  %v341_v27 = vrot.slane %v1692_v6, %v2200_v15  ;;  %v505_v28 = vrot.slane %v1708_v10, %v2200_v15  ;;  %v1953_v10 = vld [vmem:[%s2584_s2] sm:$0xff]   ;;  %1401 = vst.msk [vmem:[#allocation2] sm:$0xf] %vm1400_vm4, %v2052_v32  ;;  %s1628_s21 = sshll.u32 %s296_s20, 4  ;;  %s1615_s24 = scalar_lea.sflag [#allocation4], %s294_s17  ;;  %s1629_s21 = int_to_ptr.vmem [resolvable:$true] %s1628_s21 }
  0x1c   : > { %v512_v18 = vrot.slane %v498_v14, %v2200_v15  ;;  %v701_v30 = vrot.slane %v1720_v24, %v2200_v15  ;;  %v1954_v13 = vld [vmem:[%s2584_s2 + $0x20] ss:$0 sps:$4 sm:$0xff]   ;;  %v1955_v24 = vld [vmem:[%s2584_s2 + $0x18] sm:$0xff]   ;;  %vm1402_vm5 = vcmask 189440   ;;  %vm1612_vm6 = vcmask 58368   ;;  %s1988_s25 = scalar_lea.vmem %s1629_s21, 32 }
  0x1d   : > { %426 = vmatpush1.bf16.msra.mxu0 %v2171_v3  ;;  %522 = vmatpush1.bf16.msra.mxu1 %v2171_v3  ;;  %v708_v29 = vrot.slane %v694_v26, %v2200_v15  ;;  %p1989_p11 = scmp.ne.s32.totalorder %s1629_s21, %s1988_s25  ;;  %s1992_s9 = sshll.u32 %s2054_s26, 4  ;;  %s1993_s9 = int_to_ptr.vmem [resolvable:$false] %s1992_s9 }
  0x1e   : > { %427 = vmatprep.subr.bf16.mxu0 %v2050_v1  ;;  %523 = vmatprep.subr.bf16.mxu1 %v2050_v1  ;;  %s1994_s12 = scalar_lea.vmem %s1993_s9, 64  ;;  %p1995_p0 = scmp.lt.s32.totalorder %s1629_s21, %s1993_s9 }
  0x1f   : > { %1704 = vmatprep.mubr.msk.bf16.mxu0 %vm413_vm0, %v348_v17  ;;  %1709 = vmatprep.mubr.msk.bf16.mxu1 %vm413_vm0, %v512_v18  ;;  %v782_v17 = vsel %vm417_vm1, %v1954_v13, 0  ;;  %p1990_p12 = pnand %p1989_p11, %p2138_p5  ;;  %p1996_p1 = scmp.lt.s32.totalorder %s1994_s12, %s1988_s25 }
  0x21   : > { %428 = vmatpush1.bf16.msra.mxu0 %v2185_v5  ;;  %524 = vmatpush1.bf16.msra.mxu1 %v2185_v5  ;;  %p1991_p13 = pneg %p1990_p12  ;;  %p1997_p2 = por %p1996_p1, %p1995_p0 }
  0x22   : > { %429 = vmatprep.subr.bf16.mxu0 %v2050_v1  ;;  %525 = vmatprep.subr.bf16.mxu1 %v2050_v1 }
  0x23   : > { %p1998_p3 = pnand %p1997_p2, %p1991_p13 }
  0x25   : > { %430 = vmatpush1.bf16.msra.mxu0 %v2194_v11  ;;  %526 = vmatpush1.bf16.msra.mxu1 %v2194_v11 }
  0x26   : > { %431 = vmatprep.subr.bf16.mxu0 %v2050_v1  ;;  %527 = vmatprep.subr.bf16.mxu1 %v2050_v1 }
  0x29   : > { %432 = vmatpush1.bf16.msra.mxu0 %v2205_v16  ;;  %528 = vmatpush1.bf16.msra.mxu1 %v2205_v16 }
  0x2a   : > { %433 = vmatprep.subr.bf16.mxu0 %v2050_v1  ;;  %529 = vmatprep.subr.bf16.mxu1 %v2050_v1 }
  0x2d   : > { %434 = vmatpush1.bf16.msra.mxu0 %v2216_v19  ;;  %530 = vmatpush1.bf16.msra.mxu1 %v2216_v19 }
  0x2e   : > { %435 = vmatprep.subr.bf16.mxu0 %v2050_v1  ;;  %531 = vmatprep.subr.bf16.mxu1 %v2050_v1 }
  0x31   : > { %436 = vmatpush1.bf16.msra.mxu0 %v2229_v20  ;;  %532 = vmatpush1.bf16.msra.mxu1 %v2229_v20 }
  0x32   : > { %447 = vmatprep.subr.bf16.mxu0 %v2050_v1  ;;  %543 = vmatprep.subr.bf16.mxu1 %v2050_v1 }
  0x35   : > { %448 = vmatpush2.bf16.msra.mxu0 %v2241_v22  ;;  %544 = vmatpush2.bf16.msra.mxu1 %v2241_v22 }
  0x36   : > { %449 = vmatprep.subr.bf16.mxu0 %v2050_v1  ;;  %545 = vmatprep.subr.bf16.mxu1 %v2050_v1 }
  0x39   : > { %450 = vmatpush2.bf16.msra.mxu0 %v2248_v23  ;;  %546 = vmatpush2.bf16.msra.mxu1 %v2248_v23 }
  0x3a   : > { %451 = vmatprep.subr.bf16.mxu0 %v2050_v1  ;;  %547 = vmatprep.subr.bf16.mxu1 %v2050_v1 }
  0x3d   : > { %452 = vmatpush2.bf16.msra.mxu0 %v2258_v25  ;;  %548 = vmatpush2.bf16.msra.mxu1 %v2258_v25 }
  0x3e   : > { %713 = vmatprep.subr.bf16.mxu0 %v2050_v1  ;;  %1815 = vmatprep.subr.bf16.mxu1 %v2052_v32 }
  0x40   : > { %454 = vmatmul.mubr.bf16.vlgmr.msra.gmra.mxu0 %v341_v27  ;;  %550 = vmatmul.mubr.bf16.vlgmr.msra.gmra.mxu1 %v505_v28 }
  0x41   : > { %714 = vmatpush1.bf16.msra.mxu0 %v2151_v0  ;;  %1721 = vmatprep.mubr.msk.bf16.mxu0 %vm413_vm0, %v708_v29 }
  0x42   : > { %715 = vmatprep.subr.bf16.mxu0 %v2050_v1  ;;  %1819 = vmatprep.mubr.msk.bf16.mxu1 %vm2053_vm2, %v2052_v32 }
  0x43   : > { %1816 = vmatpush3.bf16.msra.mxu1 %v587_v33 }
  0x44   : > { %1817 = vmatprep.subr.bf16.mxu1 %v2052_v32 }
  0x45   : > { %716 = vmatpush1.bf16.msra.mxu0 %v2160_v2 }
  0x46   : > { %717 = vmatprep.subr.bf16.mxu0 %v2050_v1 }
  0x47   : > { %1818 = vmatpush3.bf16.msra.mxu1 %v1951_v34 }
  0x48   : > { %1823 = vmatprep.subr.bf16.mxu1 %v2052_v32 }
  0x49   : > { %718 = vmatpush1.bf16.msra.mxu0 %v2171_v3 }
  0x4a   : > { %719 = vmatprep.subr.bf16.mxu0 %v2050_v1 }
  0x4d   : > { %720 = vmatpush1.bf16.msra.mxu0 %v2185_v5 }
  0x4e   : > { %721 = vmatprep.subr.bf16.mxu0 %v2050_v1 }
  0x51   : > { %722 = vmatpush1.bf16.msra.mxu0 %v2194_v11 }
  0x52   : > { %723 = vmatprep.subr.bf16.mxu0 %v2050_v1 }
  0x55   : > { %724 = vmatpush1.bf16.msra.mxu0 %v2205_v16 }
  0x56   : > { %725 = vmatprep.subr.bf16.mxu0 %v2050_v1 }
  0x59   : > { %726 = vmatpush1.bf16.msra.mxu0 %v2216_v19 }
  0x5a   : > { %727 = vmatprep.subr.bf16.mxu0 %v2050_v1 }
  0x5d   : > { %728 = vmatpush1.bf16.msra.mxu0 %v2229_v20 }
  0x5e   : > { %739 = vmatprep.subr.bf16.mxu0 %v2050_v1 }
  0x61   : > { %740 = vmatpush2.bf16.msra.mxu0 %v2241_v22 }
  0x62   : > { %741 = vmatprep.subr.bf16.mxu0 %v2050_v1 }
  0x65   : > { %742 = vmatpush2.bf16.msra.mxu0 %v2248_v23 }
  0x66   : > { %743 = vmatprep.subr.bf16.mxu0 %v2050_v1 }
  0x69   : > { %744 = vmatpush2.bf16.msra.mxu0 %v2258_v25 }
  0x6a   : > { %1839 = vmatprep.subr.bf16.mxu0 %v2052_v32 }
  0x6c   : > { %746 = vmatmul.mubr.bf16.vlgmr.msra.gmra.mxu0 %v701_v30 }
  0x6d   : > { %1843 = vmatprep.mubr.msk.bf16.mxu0 %vm2053_vm2, %v2052_v32 }
 0x100   : > { %v455_v37 = vpop.f32.mrf.mxu0  ;;  %v551_v38 = vpop.f32.mrf.mxu1 }
 0x101   : > { %v467_v39 = vmul.f32 %v2309_v35, %v455_v37  ;;  %v557_v40 = vmul.f32 %v2309_v35, %v551_v38  ;;  %v1729_v38 = vld.sshfl [vmem:[%s2178_s10 + $0x6] sm:$0x11 pattern:$0x75316420] }
 0x102   : > { %v457_v41 = vpop.f32.mrf.mxu0  ;;  %v553_v42 = vpop.f32.mrf.mxu1 }
 0x103   : > { %v474_v43 = vadd.f32 %v2314_v36, %v467_v39  ;;  %v558_v44 = vadd.f32 %v2314_v36, %v557_v40  ;;  %v835_v40 = vcombine.high %v1729_v38, %v1729_v38 }
 0x104   : > { %v458_v45 = vpop.f32.mrf.mxu0  ;;  %v554_v46 = vpop.f32.mrf.mxu1 }
 0x105   : > { %v476_v47 = vmul.f32 0.044715, %v474_v43  ;;  %v560_v48 = vmul.f32 0.044715, %v558_v44  ;;  %v559_v59 = vmul.f32 0.5, %v558_v44  ;;  %v475_v9 = vmul.f32 0.5, %v474_v43 }
 0x106   : > { %v459_v49 = vpop.f32.mrf.mxu0  ;;  %v555_v50 = vpop.f32.mrf.mxu1  ;;  %v842_v46 = vrot.slane %v1729_v38, %v2200_v15  ;;  %v1959_v38 = vld [vmem:[%s2584_s2 + $0x30] sm:$0xff]  }
 0x107   : > { %v477_v51 = vmul.f32 %v476_v47, %v474_v43  ;;  %v561_v52 = vmul.f32 %v560_v48, %v558_v44  ;;  %v1956_v47 = vld [vmem:[%s2584_s2 + $0x2c] ss:$0 sps:$4 sm:$0xff]   ;;  %v1957_v49 = vld [vmem:[%s2584_s2 + $0x24] sm:$0xff]  }
 0x108   : > { %v923_v48 = vsel %vm417_vm1, %v1956_v47, 0 }
 0x109   : > { %v478_v53 = vmul.f32 %v477_v51, %v474_v43  ;;  %v562_v54 = vmul.f32 %v561_v52, %v558_v44  ;;  %1840 = vmatpush3.bf16.msra.mxu0 %v923_v48 }
 0x10a   : > { %1841 = vmatprep.subr.bf16.mxu0 %v2052_v32 }
 0x10b   : > { %v479_v55 = vadd.f32 %v478_v53, %v474_v43  ;;  %v563_v56 = vadd.f32 %v562_v54, %v558_v44  ;;  %v849_v44 = vrot.slane %v835_v40, %v2200_v15 }
 0x10d   : > { %v564_v57 = vmul.f32 0.7978846, %v563_v56  ;;  %v480_v58 = vmul.f32 0.7978846, %v479_v55  ;;  %1842 = vmatpush3.bf16.msra.mxu0 %v1957_v49 }
 0x10e   : > { %995 = vmatprep.subr.bf16.mxu0 %v2050_v1 }
 0x10f   : > { %1970 = vtanh.f32 %v564_v57 }
 0x110   : > { %1972 = vtanh.f32 %v480_v58 }
 0x11c   : > { %v1971_v60 = vpop.eup %1970 }
 0x11d   : > { %v566_v61 = vadd.f32 1.0, %v1971_v60  ;;  %v1973_v63 = vpop.eup %1972 }
 0x11e   : > { %v482_v8 = vadd.f32 1.0, %v1973_v63 }
 0x11f   : > { %v567_v4 = vmul.f32 %v566_v61, %v559_v59 }
 0x120   : > { %v483_v12 = vmul.f32 %v482_v8, %v475_v9 }
 0x121   : > { %v568_v6 = vpack.c.bf16 %v567_v4, %v567_v4 }
 0x122   : > { %v484_v14 = vpack.c.bf16 %v483_v12, %v483_v12 }
 0x123   : > { %1820 = vmatmul.mubr.msk.bf16.vlgmr.msra.gmra.mxu1 %vm582_vm3, %v568_v6 }
 0x124   : > { %1824 = vmatpush3.bf16.msra.mxu1 %v642_v7  ;;  %1827 = vmatprep.mubr.msk.bf16.mxu1 %vm2053_vm2, %v2052_v32 }
 0x125   : > { %1825 = vmatprep.subr.bf16.mxu1 %v2052_v32 }
 0x128   : > { %1826 = vmatpush3.bf16.msra.mxu1 %v1953_v10 }
 0x129   : > { %1831 = vmatprep.subr.bf16.mxu1 %v2052_v32 }
 0x12b   : > { %1828 = vmatmul.mubr.msk.bf16.vlgmr.msra.gmra.mxu1 %vm582_vm3, %v484_v14 }
 0x12c   : > { %v747_v18 = vpop.f32.mrf.mxu0  ;;  %1832 = vmatpush3.bf16.msra.mxu1 %v782_v17  ;;  %1835 = vmatprep.mubr.msk.bf16.mxu1 %vm2053_vm2, %v2052_v32 }
 0x12d   : > { %v753_v21 = vmul.f32 %v2309_v35, %v747_v18  ;;  %1833 = vmatprep.subr.bf16.mxu1 %v2052_v32 }
 0x12e   : > { %v749_v26 = vpop.f32.mrf.mxu0 }
 0x12f   : > { %v754_v27 = vadd.f32 %v2314_v36, %v753_v21  ;;  %v1738_v21 = vld.sshfl [vmem:[%s2178_s10 + $0x8] sm:$0x11 pattern:$0x75316420] }
 0x130   : > { %v750_v28 = vpop.f32.mrf.mxu0  ;;  %1834 = vmatpush3.bf16.msra.mxu1 %v1955_v24  ;;  %v976_v26 = vcombine.high %v1738_v21, %v1738_v21 }
 0x131   : > { %v756_v29 = vmul.f32 0.044715, %v754_v27  ;;  %854 = vmatprep.subr.bf16.mxu1 %v2050_v1  ;;  %v755_v41 = vmul.f32 0.5, %v754_v27 }
 0x132   : > { %v751_v30 = vpop.f32.mrf.mxu0 }
 0x133   : > { %v757_v31 = vmul.f32 %v756_v29, %v754_v27  ;;  %v990_v30 = vrot.slane %v976_v26, %v2200_v15 }
 0x135   : > { %v758_v33 = vmul.f32 %v757_v31, %v754_v27 }
 0x137   : > { %v759_v34 = vadd.f32 %v758_v33, %v754_v27  ;;  %v983_v33 = vrot.slane %v1738_v21, %v2200_v15 }
 0x139   : > { %v760_v37 = vmul.f32 0.7978846, %v759_v34  ;;  %v1958_v34 = vld [vmem:[%s2584_s2 + $0x38] ss:$0 sps:$4 sm:$0xff]  }
 0x13b   : > { %1974 = vtanh.f32 %v760_v37  ;;  %v1064_v37 = vsel %vm417_vm1, %v1958_v34, 0 }
 0x148   : > { %v1975_v39 = vpop.eup %1974 }
 0x149   : > { %v762_v42 = vadd.f32 1.0, %v1975_v39 }
 0x14b   : > { %v763_v43 = vmul.f32 %v762_v42, %v755_v41 }
 0x14d   : > { %v764_v45 = vpack.c.bf16 %v763_v43, %v763_v43 }
 0x14f   : > { %1836 = vmatmul.mubr.msk.bf16.vlgmr.msra.gmra.mxu1 %vm582_vm3, %v764_v45 }
 0x150   : > { %855 = vmatpush1.bf16.msra.mxu1 %v2151_v0  ;;  %1730 = vmatprep.mubr.msk.bf16.mxu1 %vm413_vm0, %v849_v44 }
 0x151   : > { %856 = vmatprep.subr.bf16.mxu1 %v2050_v1 }
 0x154   : > { %857 = vmatpush1.bf16.msra.mxu1 %v2160_v2 }
 0x155   : > { %858 = vmatprep.subr.bf16.mxu1 %v2050_v1 }
 0x158   : > { %859 = vmatpush1.bf16.msra.mxu1 %v2171_v3 }
 0x159   : > { %860 = vmatprep.subr.bf16.mxu1 %v2050_v1 }
 0x15c   : > { %861 = vmatpush1.bf16.msra.mxu1 %v2185_v5 }
 0x15d   : > { %862 = vmatprep.subr.bf16.mxu1 %v2050_v1 }
 0x160   : > { %863 = vmatpush1.bf16.msra.mxu1 %v2194_v11 }
 0x161   : > { %864 = vmatprep.subr.bf16.mxu1 %v2050_v1 }
 0x164   : > { %865 = vmatpush1.bf16.msra.mxu1 %v2205_v16 }
 0x165   : > { %866 = vmatprep.subr.bf16.mxu1 %v2050_v1 }
 0x168   : > { %867 = vmatpush1.bf16.msra.mxu1 %v2216_v19 }
 0x169   : > { %868 = vmatprep.subr.bf16.mxu1 %v2050_v1 }
 0x16c   : > { %869 = vmatpush1.bf16.msra.mxu1 %v2229_v20 }
 0x16d   : > { %880 = vmatprep.subr.bf16.mxu1 %v2050_v1 }
 0x170   : > { %881 = vmatpush2.bf16.msra.mxu1 %v2241_v22 }
 0x171   : > { %882 = vmatprep.subr.bf16.mxu1 %v2050_v1 }
 0x174   : > { %883 = vmatpush2.bf16.msra.mxu1 %v2248_v23 }
 0x175   : > { %884 = vmatprep.subr.bf16.mxu1 %v2050_v1 }
 0x178   : > { %885 = vmatpush2.bf16.msra.mxu1 %v2258_v25 }
 0x179   : > { %1847 = vmatprep.subr.bf16.mxu1 %v2052_v32 }
 0x17b   : > { %887 = vmatmul.mubr.bf16.vlgmr.msra.gmra.mxu1 %v842_v46 }
 0x17c   : > { %1851 = vmatprep.mubr.msk.bf16.mxu1 %vm2053_vm2, %v2052_v32  ;;  %1848 = vmatpush3.bf16.msra.mxu1 %v1064_v37 }
 0x17d   : > { %1849 = vmatprep.subr.bf16.mxu1 %v2052_v32 }
 0x180   : > { %1850 = vmatpush3.bf16.msra.mxu1 %v1959_v38 }
 0x181   : > { %1136 = vmatprep.subr.bf16.mxu1 %v2050_v1 }
 0x1e3   : > { %v623_v50 = vpop.f32.mrf.mxu1 }
 0x1e5   : > { %v1821_v51 = vpop.f32.mrf.mxu1 }
 0x1e7   : > { %v626_v52 = vpop.f32.mrf.mxu1 }
 0x1e9   : > { %v1822_v53 = vpop.f32.mrf.mxu1 }
 0x1eb   : > { %v678_v54 = vpop.f32.mrf.mxu1 }
 0x1ec   : > { %v679_v55 = vadd.f32 %v678_v54, %v623_v50 }
 0x1ed   : > { %v1829_v56 = vpop.f32.mrf.mxu1 }
 0x1ef   : > { %v681_v57 = vpop.f32.mrf.mxu1 }
 0x1f1   : > { %v1830_v58 = vpop.f32.mrf.mxu1 }
 0x20f   : > { %v818_v59 = vpop.f32.mrf.mxu1 }
 0x210   : > { %v824_v60 = vadd.f32 %v818_v59, %v679_v55  ;;  %v1747_v55 = vld.sshfl [vmem:[%s2178_s10 + $0xa] sm:$0x11 pattern:$0x75316420] }
 0x211   : > { %v1837_v61 = vpop.f32.mrf.mxu1  ;;  %v1117_v57 = vcombine.high %v1747_v55, %v1747_v55 }
 0x213   : > { %v821_v62 = vpop.f32.mrf.mxu1  ;;  %v1131_v61 = vrot.slane %v1117_v57, %v2200_v15  ;;  %v1965_v57 = vld [vmem:[%s2585_s3 + $0xc] sm:$0xff]  }
 0x215   : > { %v1838_v63 = vpop.f32.mrf.mxu1 }
 0x216   : > { %v1124_v63 = vrot.slane %v1747_v55, %v2200_v15  ;;  %v1964_v55 = vld [vmem:[%s2585_s3 + $0x14] ss:$0 sps:$4 sm:$0xff]  }
 0x23b   : > { %v888_v4 = vpop.f32.mrf.mxu1 }
 0x23c   : > { %v894_v6 = vmul.f32 %v2309_v35, %v888_v4  ;;  %v1960_v4 = vld [vmem:[%s2584_s2 + $0x44] ss:$0 sps:$4 sm:$0xff]  }
 0x23d   : > { %v890_v7 = vpop.f32.mrf.mxu1 }
 0x23e   : > { %v895_v8 = vadd.f32 %v2314_v36, %v894_v6  ;;  %v1205_v6 = vsel %vm417_vm1, %v1960_v4, 0  ;;  %v1961_v7 = vld [vmem:[%s2584_s2 + $0x3c] sm:$0xff]  }
 0x23f   : > { %v891_v9 = vpop.f32.mrf.mxu1 }
 0x240   : > { %v897_v10 = vmul.f32 0.044715, %v895_v8  ;;  %v896_v27 = vmul.f32 0.5, %v895_v8 }
 0x241   : > { %v892_v12 = vpop.f32.mrf.mxu1 }
 0x242   : > { %v898_v13 = vmul.f32 %v897_v10, %v895_v8 }
 0x244   : > { %v899_v14 = vmul.f32 %v898_v13, %v895_v8 }
 0x246   : > { %v900_v17 = vadd.f32 %v899_v14, %v895_v8 }
 0x248   : > { %v901_v18 = vmul.f32 0.7978846, %v900_v17 }
 0x24a   : > { %1976 = vtanh.f32 %v901_v18 }
 0x257   : > { %v1977_v24 = vpop.eup %1976 }
 0x258   : > { %v903_v28 = vadd.f32 1.0, %v1977_v24 }
 0x25a   : > { %v904_v29 = vmul.f32 %v903_v28, %v896_v27 }
 0x25c   : > { %v905_v31 = vpack.c.bf16 %v904_v29, %v904_v29 }
 0x25e   : > { %1844 = vmatmul.mubr.msk.bf16.vlgmr.msra.gmra.mxu0 %vm582_vm3, %v905_v31 }
 0x25f   : > { %996 = vmatpush1.bf16.msra.mxu0 %v2151_v0  ;;  %1739 = vmatprep.mubr.msk.bf16.mxu0 %vm413_vm0, %v990_v30 }
 0x260   : > { %997 = vmatprep.subr.bf16.mxu0 %v2050_v1 }
 0x263   : > { %998 = vmatpush1.bf16.msra.mxu0 %v2160_v2 }
 0x264   : > { %999 = vmatprep.subr.bf16.mxu0 %v2050_v1 }
 0x267   : > { %1000 = vmatpush1.bf16.msra.mxu0 %v2171_v3 }
 0x268   : > { %1001 = vmatprep.subr.bf16.mxu0 %v2050_v1 }
 0x26b   : > { %1002 = vmatpush1.bf16.msra.mxu0 %v2185_v5 }
 0x26c   : > { %1003 = vmatprep.subr.bf16.mxu0 %v2050_v1 }
 0x26f   : > { %1004 = vmatpush1.bf16.msra.mxu0 %v2194_v11 }
 0x270   : > { %1005 = vmatprep.subr.bf16.mxu0 %v2050_v1 }
 0x273   : > { %1006 = vmatpush1.bf16.msra.mxu0 %v2205_v16 }
 0x274   : > { %1007 = vmatprep.subr.bf16.mxu0 %v2050_v1 }
 0x277   : > { %1008 = vmatpush1.bf16.msra.mxu0 %v2216_v19 }
 0x278   : > { %1009 = vmatprep.subr.bf16.mxu0 %v2050_v1 }
 0x27b   : > { %1010 = vmatpush1.bf16.msra.mxu0 %v2229_v20 }
 0x27c   : > { %1021 = vmatprep.subr.bf16.mxu0 %v2050_v1 }
 0x27f   : > { %1022 = vmatpush2.bf16.msra.mxu0 %v2241_v22 }
 0x280   : > { %1023 = vmatprep.subr.bf16.mxu0 %v2050_v1 }
 0x283   : > { %1024 = vmatpush2.bf16.msra.mxu0 %v2248_v23 }
 0x284   : > { %1025 = vmatprep.subr.bf16.mxu0 %v2050_v1 }
 0x287   : > { %1026 = vmatpush2.bf16.msra.mxu0 %v2258_v25 }
 0x288   : > { %1855 = vmatprep.subr.bf16.mxu0 %v2052_v32 }
 0x28a   : > { %1028 = vmatmul.mubr.bf16.vlgmr.msra.gmra.mxu0 %v983_v33  ;;  %v1756_v33 = vld.sshfl [vmem:[%s2178_s10 + $0xc] sm:$0x11 pattern:$0x75316420] }
 0x28b   : > { %1859 = vmatprep.mubr.msk.bf16.mxu0 %vm2053_vm2, %v2052_v32  ;;  %1856 = vmatpush3.bf16.msra.mxu0 %v1205_v6  ;;  %v1258_v37 = vcombine.high %v1756_v33, %v1756_v33 }
 0x28c   : > { %1857 = vmatprep.subr.bf16.mxu0 %v2052_v32 }
 0x28f   : > { %1858 = vmatpush3.bf16.msra.mxu0 %v1961_v7 }
 0x290   : > { %1277 = vmatprep.subr.bf16.mxu0 %v2050_v1 }
 0x31e   : > { %v959_v39 = vpop.f32.mrf.mxu0 }
 0x31f   : > { %v965_v40 = vadd.f32 %v959_v39, %v824_v60 }
 0x320   : > { %v1845_v41 = vpop.f32.mrf.mxu0 }
 0x321   : > { %v1272_v41 = vrot.slane %v1258_v37, %v2200_v15 }
 0x322   : > { %v962_v42 = vpop.f32.mrf.mxu0 }
 0x324   : > { %v1846_v43 = vpop.f32.mrf.mxu0 }
 0x34a   : > { %v1029_v44 = vpop.f32.mrf.mxu0 }
 0x34b   : > { %v1035_v45 = vmul.f32 %v2309_v35, %v1029_v44 }
 0x34c   : > { %v1031_v46 = vpop.f32.mrf.mxu0 }
 0x34d   : > { %v1036_v47 = vadd.f32 %v2314_v36, %v1035_v45 }
 0x34e   : > { %v1032_v48 = vpop.f32.mrf.mxu0 }
 0x34f   : > { %v1038_v49 = vmul.f32 0.044715, %v1036_v47  ;;  %v1037_v58 = vmul.f32 0.5, %v1036_v47 }
 0x350   : > { %v1033_v50 = vpop.f32.mrf.mxu0 }
 0x351   : > { %v1039_v51 = vmul.f32 %v1038_v49, %v1036_v47 }
 0x353   : > { %v1040_v52 = vmul.f32 %v1039_v51, %v1036_v47 }
 0x355   : > { %v1041_v53 = vadd.f32 %v1040_v52, %v1036_v47 }
 0x357   : > { %v1042_v54 = vmul.f32 0.7978846, %v1041_v53 }
 0x359   : > { %1978 = vtanh.f32 %v1042_v54 }
 0x366   : > { %v1979_v56 = vpop.eup %1978 }
 0x367   : > { %v1044_v59 = vadd.f32 1.0, %v1979_v56  ;;  %v1428_v56 = vsel %vm417_vm1, %v1964_v55, 0 }
 0x369   : > { %v1045_v60 = vmul.f32 %v1044_v59, %v1037_v58 }
 0x36b   : > { %v1046_v62 = vpack.c.bf16 %v1045_v60, %v1045_v60 }
 0x36d   : > { %1852 = vmatmul.mubr.msk.bf16.vlgmr.msra.gmra.mxu1 %vm582_vm3, %v1046_v62 }
 0x36e   : > { %1137 = vmatpush1.bf16.msra.mxu1 %v2151_v0  ;;  %1748 = vmatprep.mubr.msk.bf16.mxu1 %vm413_vm0, %v1131_v61 }
 0x36f   : > { %1138 = vmatprep.subr.bf16.mxu1 %v2050_v1 }
 0x372   : > { %1139 = vmatpush1.bf16.msra.mxu1 %v2160_v2 }
 0x373   : > { %1140 = vmatprep.subr.bf16.mxu1 %v2050_v1 }
 0x376   : > { %1141 = vmatpush1.bf16.msra.mxu1 %v2171_v3 }
 0x377   : > { %1142 = vmatprep.subr.bf16.mxu1 %v2050_v1 }
 0x37a   : > { %1143 = vmatpush1.bf16.msra.mxu1 %v2185_v5 }
 0x37b   : > { %1144 = vmatprep.subr.bf16.mxu1 %v2050_v1 }
 0x37e   : > { %1145 = vmatpush1.bf16.msra.mxu1 %v2194_v11 }
 0x37f   : > { %1146 = vmatprep.subr.bf16.mxu1 %v2050_v1 }
 0x382   : > { %1147 = vmatpush1.bf16.msra.mxu1 %v2205_v16 }
 0x383   : > { %1148 = vmatprep.subr.bf16.mxu1 %v2050_v1 }
 0x386   : > { %1149 = vmatpush1.bf16.msra.mxu1 %v2216_v19 }
 0x387   : > { %1150 = vmatprep.subr.bf16.mxu1 %v2050_v1 }
 0x38a   : > { %1151 = vmatpush1.bf16.msra.mxu1 %v2229_v20 }
 0x38b   : > { %1162 = vmatprep.subr.bf16.mxu1 %v2050_v1 }
 0x38e   : > { %1163 = vmatpush2.bf16.msra.mxu1 %v2241_v22 }
 0x38f   : > { %1164 = vmatprep.subr.bf16.mxu1 %v2050_v1 }
 0x392   : > { %1165 = vmatpush2.bf16.msra.mxu1 %v2248_v23 }
 0x393   : > { %1166 = vmatprep.subr.bf16.mxu1 %v2050_v1 }
 0x396   : > { %1167 = vmatpush2.bf16.msra.mxu1 %v2258_v25 }
 0x397   : > { %1863 = vmatprep.subr.bf16.mxu1 %v2052_v32 }
 0x399   : > { %1169 = vmatmul.mubr.bf16.vlgmr.msra.gmra.mxu1 %v1124_v63 }
 0x39a   : > { %1867 = vmatprep.mubr.msk.bf16.mxu1 %vm2053_vm2, %v2052_v32 }
 0x42d   : > { %v1100_v8 = vpop.f32.mrf.mxu1 }
 0x42e   : > { %v1106_v9 = vadd.f32 %v1100_v8, %v965_v40 }
 0x42f   : > { %v1853_v10 = vpop.f32.mrf.mxu1 }
 0x431   : > { %v1103_v12 = vpop.f32.mrf.mxu1 }
 0x433   : > { %v1854_v13 = vpop.f32.mrf.mxu1 }
 0x459   : > { %v1170_v14 = vpop.f32.mrf.mxu1 }
 0x45a   : > { %v1176_v17 = vmul.f32 %v2309_v35, %v1170_v14 }
 0x45b   : > { %v1172_v18 = vpop.f32.mrf.mxu1 }
 0x45c   : > { %v1177_v21 = vadd.f32 %v2314_v36, %v1176_v17 }
 0x45d   : > { %v1173_v24 = vpop.f32.mrf.mxu1 }
 0x45e   : > { %v1179_v26 = vmul.f32 0.044715, %v1177_v21  ;;  %v1178_v38 = vmul.f32 0.5, %v1177_v21  ;;  %v1967_v24 = vld [vmem:[%s2585_s3] sm:$0xff]  }
 0x45f   : > { %v1174_v27 = vpop.f32.mrf.mxu1 }
 0x460   : > { %v1180_v28 = vmul.f32 %v1179_v26, %v1177_v21  ;;  %v1968_v26 = vld [vmem:[%s2585_s3 + $0x20] ss:$0 sps:$4 sm:$0xff]  }
 0x462   : > { %v1181_v29 = vmul.f32 %v1180_v28, %v1177_v21 }
 0x464   : > { %v1182_v30 = vadd.f32 %v1181_v29, %v1177_v21  ;;  %v1544_v29 = vsel %vm417_vm1, %v1968_v26, 0 }
 0x466   : > { %v1183_v31 = vmul.f32 0.7978846, %v1182_v30  ;;  %v1969_v30 = vld [vmem:[%s2585_s3 + $0x18] sm:$0xff]  }
 0x468   : > { %1980 = vtanh.f32 %v1183_v31 }
 0x475   : > { %v1981_v34 = vpop.eup %1980 }
 0x476   : > { %v1185_v39 = vadd.f32 1.0, %v1981_v34 }
 0x478   : > { %v1186_v40 = vmul.f32 %v1185_v39, %v1178_v38 }
 0x47a   : > { %v1187_v42 = vpack.c.bf16 %v1186_v40, %v1186_v40 }
 0x47c   : > { %1860 = vmatmul.mubr.msk.bf16.vlgmr.msra.gmra.mxu0 %vm582_vm3, %v1187_v42 }
 0x47d   : > { %1278 = vmatpush1.bf16.msra.mxu0 %v2151_v0  ;;  %1757 = vmatprep.mubr.msk.bf16.mxu0 %vm413_vm0, %v1272_v41  ;;  %v1265_v0 = vrot.slane %v1756_v33, %v2200_v15 }
 0x47e   : > { %1279 = vmatprep.subr.bf16.mxu0 %v2050_v1 }
 0x481   : > { %1280 = vmatpush1.bf16.msra.mxu0 %v2160_v2  ;;  %v1962_v2 = vld [vmem:[%s2584_s2 + $0x50] ss:$0 sps:$4 sm:$0xff]  }
 0x482   : > { %1281 = vmatprep.subr.bf16.mxu0 %v2050_v1 }
 0x485   : > { %1282 = vmatpush1.bf16.msra.mxu0 %v2171_v3  ;;  %v1346_v3 = vsel %vm417_vm1, %v1962_v2, 0 }
 0x486   : > { %1283 = vmatprep.subr.bf16.mxu0 %v2050_v1  ;;  %1864 = vmatpush3.bf16.msra.mxu1 %v1346_v3 }
 0x487   : > { %1865 = vmatprep.subr.bf16.mxu1 %v2052_v32 }
 0x489   : > { %1284 = vmatpush1.bf16.msra.mxu0 %v2185_v5  ;;  %v1963_v5 = vld [vmem:[%s2584_s2 + $0x48] sm:$0xff]  }
 0x48a   : > { %1285 = vmatprep.subr.bf16.mxu0 %v2050_v1  ;;  %1866 = vmatpush3.bf16.msra.mxu1 %v1963_v5 }
 0x48b   : > { %1871 = vmatprep.subr.bf16.mxu1 %v2052_v32 }
 0x48d   : > { %1286 = vmatpush1.bf16.msra.mxu0 %v2194_v11 }
 0x48e   : > { %1287 = vmatprep.subr.bf16.mxu0 %v2050_v1 }
 0x491   : > { %1288 = vmatpush1.bf16.msra.mxu0 %v2205_v16 }
 0x492   : > { %1289 = vmatprep.subr.bf16.mxu0 %v2050_v1 }
 0x495   : > { %1290 = vmatpush1.bf16.msra.mxu0 %v2216_v19 }
 0x496   : > { %1291 = vmatprep.subr.bf16.mxu0 %v2050_v1 }
 0x499   : > { %1292 = vmatpush1.bf16.msra.mxu0 %v2229_v20 }
 0x49a   : > { %1303 = vmatprep.subr.bf16.mxu0 %v2050_v1 }
 0x49d   : > { %1304 = vmatpush2.bf16.msra.mxu0 %v2241_v22 }
 0x49e   : > { %1305 = vmatprep.subr.bf16.mxu0 %v2050_v1 }
 0x4a1   : > { %1306 = vmatpush2.bf16.msra.mxu0 %v2248_v23 }
 0x4a2   : > { %1307 = vmatprep.subr.bf16.mxu0 %v2050_v1 }
 0x4a5   : > { %1308 = vmatpush2.bf16.msra.mxu0 %v2258_v25 }
 0x4a8   : > { %1310 = vmatmul.mubr.bf16.vlgmr.msra.gmra.mxu0 %v1265_v0 }
 0x53c   : > { %v1241_v1 = vpop.f32.mrf.mxu0 }
 0x53d   : > { %v1247_v11 = vadd.f32 %v1241_v1, %v1106_v9  ;;  %v1780_v1 = vld [vmem:[%s2589_s7] ss:$0 sm:$0xff] }
 0x53e   : > { %v1861_v15 = vpop.f32.mrf.mxu0 }
 0x540   : > { %v1244_v16 = vpop.f32.mrf.mxu0 }
 0x542   : > { %v1862_v19 = vpop.f32.mrf.mxu0 }
 0x568   : > { %v1311_v20 = vpop.f32.mrf.mxu0 }
 0x569   : > { %v1317_v22 = vmul.f32 %v2309_v35, %v1311_v20 }
 0x56a   : > { %v1313_v23 = vpop.f32.mrf.mxu0 }
 0x56b   : > { %v1318_v25 = vadd.f32 %v2314_v36, %v1317_v22 }
 0x56c   : > { %v1314_v43 = vpop.f32.mrf.mxu0 }
 0x56d   : > { %v1320_v44 = vmul.f32 0.044715, %v1318_v25  ;;  %v1319_v51 = vmul.f32 0.5, %v1318_v25 }
 0x56e   : > { %v1315_v45 = vpop.f32.mrf.mxu0 }
 0x56f   : > { %v1321_v46 = vmul.f32 %v1320_v44, %v1318_v25 }
 0x571   : > { %v1322_v47 = vmul.f32 %v1321_v46, %v1318_v25 }
 0x573   : > { %v1323_v48 = vadd.f32 %v1322_v47, %v1318_v25 }
 0x575   : > { %v1324_v49 = vmul.f32 0.7978846, %v1323_v48 }
 0x577   : > { %1982 = vtanh.f32 %v1324_v49 }
 0x584   : > { %v1983_v50 = vpop.eup %1982 }
 0x585   : > { %v1326_v52 = vadd.f32 1.0, %v1983_v50 }
 0x587   : > { %v1327_v53 = vmul.f32 %v1326_v52, %v1319_v51 }
 0x589   : > { %v1328_v54 = vpack.c.bf16 %v1327_v53, %v1327_v53 }
 0x58b   : > { %1868 = vmatmul.mubr.msk.bf16.vlgmr.msra.gmra.mxu1 %vm582_vm3, %v1328_v54 }
 0x58c   : > { %1875 = vmatprep.mubr.msk.bf16.mxu1 %vm2053_vm2, %v2052_v32  ;;  %1872 = vmatpush3.bf16.msra.mxu1 %v1428_v56 }
 0x58d   : > { %1873 = vmatprep.subr.bf16.mxu1 %v2052_v32 }
 0x590   : > { %1874 = vmatpush3.bf16.msra.mxu1 %v1965_v57 }
 0x591   : > { %1879 = vmatprep.subr.bf16.mxu1 %v2052_v32 }
 0x64b   : > { %v1382_v58 = vpop.f32.mrf.mxu1 }
 0x64c   : > { %v1388_v59 = vadd.f32 %v1382_v58, %v1247_v11 }
 0x64d   : > { %v1869_v60 = vpop.f32.mrf.mxu1 }
 0x64e   : > { %v1389_v61 = vmul.f32 %v2309_v35, %v1388_v59  ;;  %v1966_v35 = vld [vmem:[%s2585_s3 + $0x8] ss:$0 sps:$4 sm:$0xff]  }
 0x64f   : > { %v1385_v62 = vpop.f32.mrf.mxu1 }
 0x650   : > { %v1390_v63 = vadd.f32 %v2314_v36, %v1389_v61  ;;  %v1483_v36 = vsel %vm417_vm1, %v1966_v35, 0 }
 0x651   : > { %v1870_v4 = vpop.f32.mrf.mxu1 }
 0x652   : > { %v1392_v6 = vmul.f32 0.044715, %v1390_v63  ;;  %v1391_v13 = vmul.f32 0.5, %v1390_v63 }
 0x654   : > { %v1393_v7 = vmul.f32 %v1392_v6, %v1390_v63 }
 0x656   : > { %v1394_v8 = vmul.f32 %v1393_v7, %v1390_v63 }
 0x658   : > { %v1395_v9 = vadd.f32 %v1394_v8, %v1390_v63 }
 0x65a   : > { %v1396_v10 = vmul.f32 0.7978846, %v1395_v9 }
 0x65c   : > { %1984 = vtanh.f32 %v1396_v10 }
 0x669   : > { %v1985_v12 = vpop.eup %1984 }
 0x66a   : > { %v1398_v14 = vadd.f32 1.0, %v1985_v12 }
 0x66c   : > { %v1399_v17 = vmul.f32 %v1398_v14, %v1391_v13 }
 0x66e   : > { %1403 = vst.msk [vmem:[#allocation2 + $0x1] sm:$0x3] %vm1402_vm5, %v1399_v17 }
 0x675   : > { %v1409_v18 = vld [vmem:[#allocation2 + $0x1] sm:$0x3] }
 0x676   : > { %v1410_v21 = vpack.c.bf16 %v1409_v18, %v1409_v18  ;;  %v1404_v27 = vld [vmem:[#allocation2] sm:$0x3]  ;;  %v1525_v31 = vld [vmem:[#allocation2 + $0x2] sm:$0x3] }
 0x677   : > { %v1405_v28 = vpack.c.bf16 %v1404_v27, %v1404_v27  ;;  %v1526_v33 = vpack.c.bf16 %v1525_v31, %v1525_v31 }
 0x678   : > { %1876 = vmatmul.mubr.msk.bf16.vlgmr.msra.gmra.mxu1 %vm582_vm3, %v1410_v21 }
 0x679   : > { %1880 = vmatpush3.bf16.msra.mxu1 %v1483_v36  ;;  %1883 = vmatprep.mubr.msk.bf16.mxu1 %vm2053_vm2, %v2052_v32 }
 0x67a   : > { %1881 = vmatprep.subr.bf16.mxu1 %v2052_v32 }
 0x67d   : > { %1882 = vmatpush3.bf16.msra.mxu1 %v1967_v24 }
 0x67e   : > { %1887 = vmatprep.subr.bf16.mxu1 %v2052_v32 }
 0x680   : > { %1884 = vmatmul.mubr.msk.bf16.vlgmr.msra.gmra.mxu1 %vm582_vm3, %v1405_v28 }
 0x681   : > { %1888 = vmatpush3.bf16.msra.mxu1 %v1544_v29  ;;  %1891 = vmatprep.mubr.msk.bf16.mxu1 %vm2053_vm2, %v2052_v32 }
 0x682   : > { %1889 = vmatprep.subr.bf16.mxu1 %v2052_v32  ;;  %v1779_v32 = vld [vmem:[%s2588_s6] ss:$0 sm:$0xff] }
 0x685   : > { %1890 = vmatpush3.bf16.msra.mxu1 %v1969_v30 }
 0x688   : > { %1892 = vmatmul.mubr.msk.bf16.vlgmr.msra.gmra.mxu1 %vm582_vm3, %v1526_v33 }
 0x738   : > { %v1464_v34 = vpop.f32.mrf.mxu1 }
 0x73a   : > { %v1877_v37 = vpop.f32.mrf.mxu1 }
 0x73c   : > { %v1467_v38 = vpop.f32.mrf.mxu1 }
 0x73e   : > { %v1878_v39 = vpop.f32.mrf.mxu1 }
 0x740   : > { %v1519_v40 = vpop.f32.mrf.mxu1 }
 0x741   : > { %v1520_v2 = vadd.f32 %v1519_v40, %v1464_v34 }
 0x742   : > { %v1885_v41 = vpop.f32.mrf.mxu1 }
 0x744   : > { %v1522_v42 = vpop.f32.mrf.mxu1 }
 0x746   : > { %v1886_v0 = vpop.f32.mrf.mxu1 }
 0x748   : > { %v1580_v3 = vpop.f32.mrf.mxu1 }
 0x749   : > { %v1586_v5 = vadd.f32 %v1580_v3, %v1520_v2 }
 0x74a   : > { %v1893_v11 = vpop.f32.mrf.mxu1 }
 0x74b   : > { %v1594_v15 = vmul.f32 %v1779_v32, %v1586_v5 }
 0x74c   : > { %v1583_v16 = vpop.f32.mrf.mxu1 }
 0x74d   : > { %v1602_v19 = vadd.f32 %v1780_v1, %v1594_v15 }
 0x74e   : > { %v1894_v20 = vpop.f32.mrf.mxu1 }
 0x74f   : > { %v1604_v22 = vmul.f32 0.044715, %v1602_v19  ;;  %v1603_v46 = vmul.f32 0.5, %v1602_v19 }
 0x751   : > { %v1605_v23 = vmul.f32 %v1604_v22, %v1602_v19 }
 0x753   : > { %v1606_v25 = vmul.f32 %v1605_v23, %v1602_v19 }
 0x755   : > { %v1607_v43 = vadd.f32 %v1606_v25, %v1602_v19 }
 0x757   : > { %v1608_v44 = vmul.f32 0.7978846, %v1607_v43 }
 0x759   : > { %1986 = vtanh.f32 %v1608_v44 }
 0x766   : > { %v1987_v45 = vpop.eup %1986 }
 0x767   : > { %v1610_v47 = vadd.f32 1.0, %v1987_v45 }
 0x769   : > { %v1611_v48 = vmul.f32 %v1610_v47, %v1603_v46 }
 0x76b   : > { %1613 = vst.msk [vmem:[%s296_s20] sm:$0x3] %vm1612_vm6, %v1611_v48 }
 0x76c   : > { %2001 = shalt.err (!%p1998_p3)
}
 0x76d   : > { %s2002_s13 = scalar_lea.hbm %s1626_s23, 32  ;;  %s2006_s19 = scalar_lea.hbm %s2590_s8, 64 }
 0x76e   : > { %p2003_p4 = scmp.ne.s32.totalorder %s1626_s23, %s2002_s13  ;;  %p2007_p9 = scmp.lt.s32.totalorder %s1626_s23, %s2590_s8 }
 0x76f   : > { %p2008_p10 = scmp.lt.s32.totalorder %s2006_s19, %s2002_s13 }
 0x770   : > { %p2004_p7 = pnand %p2003_p4, %p2138_p5 }
 0x771   : > { %p2009_p11 = por %p2008_p10, %p2007_p9 }
 0x772   : > { %p2005_p8 = pneg %p2004_p7 }
 0x774   : > { %p2010_p12 = pnand %p2009_p11, %p2005_p8 }
 0x776   : > { %2013 = shalt.err (!%p2010_p12)
}
 0x777   : > { %1896 = dma.vmem_to_hbm [thread:$0]  (%p2138_p5), %s1629_s21, 32, %s1626_s23, %s1615_s24  }
 0x778 PF: > { %p1902_p13 = scmp.ge.s32.totalorder %s2048_s30, 2  ;;  %s1640_s10 = sand.u32 1, %s2036_s27  }
 0x779   : > { %s1641_s25 = scalar_lea.sflag [#allocation4], %s1640_s10 }
 0x77a   : > { %p1899_p0 = pnand %p1902_p13, %p2142_p6 }
 0x77c   : > { %p1900_p1 = pneg %p1899_p0 }
 0x77e   : > { %2031 = dma.done.wait (%p1900_p1), %s1641_s25, 32  }
 0x77f   : > { %2033 = vsyncadd (%p1900_p1), %s1641_s25, 4294967264  ;;  %p18_p2 = scmp.ge.s32.totalorder %s2125_s11, 4   ;;  %s2593_s27 = smov %s2040_s28 }
 0x780   : > { %s2594_s28 = smov %s2044_s29  ;;  %s2595_s29 = smov %s2136_s14 }
 0x781   : > { %s2596_s30 = smov %s2125_s11  ;;  %20 = sbr.rel (!%p18_p2) target bundleno = 3 (0x3), region = 101 }
 0x786   :  { %1646 = vsyncpa [#allocation4], 1 }
 0x787   :  { %1648 = vsyncpa [#allocation4 + $0x1], 1 }

</bundles_post_ra>
